<compile_context>
chip_gen: v7x
topology: tpu7x:2x2x1
jax: 0.10.0
libtpu: 0.0.40
codegen_flags: <defaults>
</compile_context>

<pallas_src>
import functools

import jax
import jax.numpy as jnp
import numpy as np
from jax.experimental import pallas as pl
from jax.experimental.pallas import tpu as pltpu


def _lstm_kernel(xb0_ref, whh0_ref, wih1_ref, whh1_ref, b1_ref,
                 wfc_ref, bfc_ref, out_ref, *, hidden, seq_len):
    H = hidden
    B = out_ref.shape[0]

    def activations(gates):
        # Gate columns are [i | f | o | g]: the three sigmoid gates are
        # contiguous, so one wide tanh-form sigmoid + one tanh cover all four.
        sig = 0.5 * jnp.tanh(0.5 * gates[:, :3 * H]) + 0.5
        i = sig[:, 0 * H:1 * H]
        f = sig[:, 1 * H:2 * H]
        o = sig[:, 2 * H:3 * H]
        g = jnp.tanh(gates[:, 3 * H:4 * H])
        return i, f, o, g

    def body(t, carry):
        h0, c0, h1, c1 = carry

        # ---- layer 0: x-contribution + bias precomputed per timestep ----
        g0 = xb0_ref[t] + jnp.dot(h0, whh0_ref[...],
                                  preferred_element_type=jnp.float32)
        i0, f0, o0, gg0 = activations(g0)
        c0 = f0 * c0 + i0 * gg0
        h0 = o0 * jnp.tanh(c0)

        # ---- layer 1: two K=H dots (no concat), weights read at use ----
        g1 = (jnp.dot(h0, wih1_ref[...], preferred_element_type=jnp.float32)
              + jnp.dot(h1, whh1_ref[...], preferred_element_type=jnp.float32)
              + b1_ref[...])
        i1, f1, o1, gg1 = activations(g1)
        c1 = f1 * c1 + i1 * gg1
        h1 = o1 * jnp.tanh(c1)

        return (h0, c0, h1, c1)

    zeros = jnp.zeros((B, H), jnp.float32)
    _, _, h1, _ = jax.lax.fori_loop(
        0, seq_len, body, (zeros, zeros, zeros, zeros), unroll=True)

    # fc on the last timestep's top-layer hidden state: VPU mul + lane reduce
    # (avoids an N=1 MXU matmul).
    out_ref[...] = (jnp.sum(h1 * wfc_ref[...], axis=-1, keepdims=True)
                    + bfc_ref[...])


def _permute_gates(w):
    """Reorder the 4H gate axis (axis 0) from PyTorch [i,f,g,o] to [i,f,o,g]."""
    i, f, g, o = jnp.split(w, 4, axis=0)
    return jnp.concatenate([i, f, o, g], axis=0)


def lstm_model_forward(x, raw_params, *, hidden):
    """x: (B, T, IN) float32 (batch_first, like the PyTorch module).

    raw_params: (W_ih0, W_hh0, b_ih0, b_hh0, W_ih1, W_hh1, b_ih1, b_hh1,
                 W_fc, b_fc) with the same shapes nn.LSTM / nn.Linear create.
    """
    (W_ih0, W_hh0, b_ih0, b_hh0,
     W_ih1, W_hh1, b_ih1, b_hh1, W_fc, b_fc) = raw_params
    B, T, IN = x.shape
    H = hidden

    # Time-major layout so the in-kernel loop indexes the leading axis.
    x_tbi = jnp.transpose(x, (1, 0, 2))                     # (T, B, IN)

    # One-time parameter packing (gate-permuted [i|f|o|g], pre-transposed,
    # fused biases) and precomputation of the layer-0 input contribution for
    # every timestep: removes per-step broadcast/add work from the serial
    # dependency chain inside the kernel.
    wih0_p = _permute_gates(W_ih0).T                        # (IN, 4H)
    whh0_p = _permute_gates(W_hh0).T                        # (H, 4H)
    b0 = _permute_gates(b_ih0 + b_hh0)                      # (4H,)
    xb0 = x_tbi @ wih0_p + b0[None, None, :]                # (T, B, 4H)

    wih1_p = _permute_gates(W_ih1).T                        # (H, 4H)
    whh1_p = _permute_gates(W_hh1).T                        # (H, 4H)
    b1_b = jnp.broadcast_to(
        _permute_gates(b_ih1 + b_hh1)[None, :], (B, 4 * H))  # (B, 4H)
    wfc_row = W_fc                                           # (1, H)
    bfc_2d = b_fc[None, :]                                   # (1, 1)

    kernel = functools.partial(_lstm_kernel, hidden=H, seq_len=T)
    vmem = pl.BlockSpec(memory_space=pltpu.MemorySpace.VMEM)
    return pl.pallas_call(
        kernel,
        out_shape=jax.ShapeDtypeStruct((B, 1), jnp.float32),
        in_specs=[vmem] * 7,      # whole arrays resident in VMEM, no pipelining
        out_specs=vmem,
    )(xb0, whh0_p, wih1_p, whh1_p, b1_b, wfc_row, bfc_2d)


def lstm_model_ref(x, raw):
    """Pure-JAX reference matching torch.nn.LSTM(batch_first)+Linear semantics."""
    (W_ih0, W_hh0, b_ih0, b_hh0, W_ih1, W_hh1, b_ih1, b_hh1, W_fc, b_fc) = raw
    B = x.shape[0]
    H = W_hh0.shape[1]

    def cell(h, c, inp, W_ih, W_hh, b_ih, b_hh):
        gates = inp @ W_ih.T + h @ W_hh.T + b_ih + b_hh
        i, f, g, o = jnp.split(gates, 4, axis=-1)
        c = jax.nn.sigmoid(f) * c + jax.nn.sigmoid(i) * jnp.tanh(g)
        h = jax.nn.sigmoid(o) * jnp.tanh(c)
        return h, c

    def step(carry, x_t):
        h0, c0, h1, c1 = carry
        h0, c0 = cell(h0, c0, x_t, W_ih0, W_hh0, b_ih0, b_hh0)
        h1, c1 = cell(h1, c1, h0, W_ih1, W_hh1, b_ih1, b_hh1)
        return (h0, c0, h1, c1), None

    init = tuple(jnp.zeros((B, H), jnp.float32) for _ in range(4))
    (h0, c0, h1, c1), _ = jax.lax.scan(step, init, jnp.transpose(x, (1, 0, 2)))
    return h1 @ W_fc.T + b_fc


if __name__ == "__main__":
    B, T, IN, H = 2, 8, 1, 64  # input_size=1, hidden_size=64, num_layers=2

    key = jax.random.PRNGKey(0)
    ks = jax.random.split(key, 11)
    bound = 1.0 / np.sqrt(H)
    u = lambda k, shape: jax.random.uniform(k, shape, jnp.float32, -bound, bound)

    # Raw parameters with the same shapes nn.LSTM / nn.Linear would create.
    W_ih0 = u(ks[0], (4 * H, IN))
    W_hh0 = u(ks[1], (4 * H, H))
    b_ih0 = u(ks[2], (4 * H,))
    b_hh0 = u(ks[3], (4 * H,))
    W_ih1 = u(ks[4], (4 * H, H))
    W_hh1 = u(ks[5], (4 * H, H))
    b_ih1 = u(ks[6], (4 * H,))
    b_hh1 = u(ks[7], (4 * H,))
    W_fc = u(ks[8], (1, H))
    b_fc = u(ks[9], (1,))

    raw = (W_ih0, W_hh0, b_ih0, b_hh0,
           W_ih1, W_hh1, b_ih1, b_hh1, W_fc, b_fc)

    x = jax.random.normal(ks[10], (B, T, IN), jnp.float32)

    out = jax.block_until_ready(lstm_model_forward(x, raw, hidden=H))
    ref = jax.block_until_ready(lstm_model_ref(x, raw))

    assert out.shape == (B, 1)
    np.testing.assert_allclose(np.asarray(out), np.asarray(ref),
                               rtol=1e-5, atol=1e-5)
    print("KERNEL_OK")
</pallas_src>

<mosaic_0001>
module attributes {stable_mosaic.version = 11 : i64} {
  func.func @_lstm_kernel(%arg0: memref<8x2x256xf32, #tpu.memory_space<vmem>>, %arg1: memref<64x256xf32, #tpu.memory_space<vmem>>, %arg2: memref<64x256xf32, #tpu.memory_space<vmem>>, %arg3: memref<64x256xf32, #tpu.memory_space<vmem>>, %arg4: memref<2x256xf32, #tpu.memory_space<vmem>>, %arg5: memref<1x64xf32, #tpu.memory_space<vmem>>, %arg6: memref<1x1xf32, #tpu.memory_space<vmem>>, %arg7: memref<2x1xf32, #tpu.memory_space<vmem>>) attributes {dimension_semantics = [], scalar_prefetch = 0 : i64, scratch_operands = 0 : i64, tpu.core_type = #tpu.core_type<tc>} {
    %cst = arith.constant 0.000000e+00 : f32
    %0 = vector.broadcast %cst : f32 to vector<2x64xf32>
    %c0_i32 = arith.constant 0 : i32
    %1 = arith.index_cast %c0_i32 : i32 to index
    %c0 = arith.constant 0 : index
    %c0_0 = arith.constant 0 : index
    %2 = vector.load %arg0[%1, %c0, %c0_0] : memref<8x2x256xf32, #tpu.memory_space<vmem>>, vector<1x2x256xf32>
    %3 = vector.shape_cast %2 : vector<1x2x256xf32> to vector<2x256xf32>
    %c0_1 = arith.constant 0 : index
    %c0_2 = arith.constant 0 : index
    %4 = vector.load %arg1[%c0_1, %c0_2] : memref<64x256xf32, #tpu.memory_space<vmem>>, vector<64x256xf32>
    %cst_3 = arith.constant dense<0.000000e+00> : vector<2x256xf32>
    %5 = tpu.matmul %0, %4, %cst_3 {dimension_numbers = #tpu.dot_dimension_numbers<[1], [0], [0], [1], [0, 0, 1, 1], [], []>} : vector<2x64xf32>, vector<64x256xf32>, vector<2x256xf32> -> vector<2x256xf32>
    %6 = arith.addf %3, %5 : vector<2x256xf32>
    %7 = vector.extract_strided_slice %6 {offsets = [0, 0], sizes = [2, 192], strides = [1, 1]} : vector<2x256xf32> to vector<2x192xf32>
    %cst_4 = arith.constant 5.000000e-01 : f32
    %8 = vector.broadcast %cst_4 : f32 to vector<2x192xf32>
    %9 = arith.mulf %8, %7 : vector<2x192xf32>
    %10 = math.tanh %9 : vector<2x192xf32>
    %cst_5 = arith.constant 5.000000e-01 : f32
    %11 = vector.broadcast %cst_5 : f32 to vector<2x192xf32>
    %12 = arith.mulf %11, %10 : vector<2x192xf32>
    %cst_6 = arith.constant 5.000000e-01 : f32
    %13 = vector.broadcast %cst_6 : f32 to vector<2x192xf32>
    %14 = arith.addf %12, %13 : vector<2x192xf32>
    %15 = vector.extract_strided_slice %14 {offsets = [0, 0], sizes = [2, 64], strides = [1, 1]} : vector<2x192xf32> to vector<2x64xf32>
    %16 = vector.extract_strided_slice %14 {offsets = [0, 64], sizes = [2, 64], strides = [1, 1]} : vector<2x192xf32> to vector<2x64xf32>
    %17 = vector.extract_strided_slice %14 {offsets = [0, 128], sizes = [2, 64], strides = [1, 1]} : vector<2x192xf32> to vector<2x64xf32>
    %18 = vector.extract_strided_slice %6 {offsets = [0, 192], sizes = [2, 64], strides = [1, 1]} : vector<2x256xf32> to vector<2x64xf32>
    %19 = math.tanh %18 : vector<2x64xf32>
    %20 = arith.mulf %16, %0 : vector<2x64xf32>
    %21 = arith.mulf %15, %19 : vector<2x64xf32>
    %22 = arith.addf %20, %21 : vector<2x64xf32>
    %23 = math.tanh %22 : vector<2x64xf32>
    %24 = arith.mulf %17, %23 : vector<2x64xf32>
    %c0_7 = arith.constant 0 : index
    %c0_8 = arith.constant 0 : index
    %25 = vector.load %arg2[%c0_7, %c0_8] : memref<64x256xf32, #tpu.memory_space<vmem>>, vector<64x256xf32>
    %cst_9 = arith.constant dense<0.000000e+00> : vector<2x256xf32>
    %26 = tpu.matmul %24, %25, %cst_9 {dimension_numbers = #tpu.dot_dimension_numbers<[1], [0], [0], [1], [0, 0, 1, 1], [], []>} : vector<2x64xf32>, vector<64x256xf32>, vector<2x256xf32> -> vector<2x256xf32>
    %c0_10 = arith.constant 0 : index
    %c0_11 = arith.constant 0 : index
    %27 = vector.load %arg3[%c0_10, %c0_11] : memref<64x256xf32, #tpu.memory_space<vmem>>, vector<64x256xf32>
    %cst_12 = arith.constant dense<0.000000e+00> : vector<2x256xf32>
    %28 = tpu.matmul %0, %27, %cst_12 {dimension_numbers = #tpu.dot_dimension_numbers<[1], [0], [0], [1], [0, 0, 1, 1], [], []>} : vector<2x64xf32>, vector<64x256xf32>, vector<2x256xf32> -> vector<2x256xf32>
    %29 = arith.addf %26, %28 : vector<2x256xf32>
    %c0_13 = arith.constant 0 : index
    %c0_14 = arith.constant 0 : index
    %30 = vector.load %arg4[%c0_13, %c0_14] : memref<2x256xf32, #tpu.memory_space<vmem>>, vector<2x256xf32>
    %31 = arith.addf %29, %30 : vector<2x256xf32>
    %32 = vector.extract_strided_slice %31 {offsets = [0, 0], sizes = [2, 192], strides = [1, 1]} : vector<2x256xf32> to vector<2x192xf32>
    %cst_15 = arith.constant 5.000000e-01 : f32
    %33 = vector.broadcast %cst_15 : f32 to vector<2x192xf32>
    %34 = arith.mulf %33, %32 : vector<2x192xf32>
    %35 = math.tanh %34 : vector<2x192xf32>
    %cst_16 = arith.constant 5.000000e-01 : f32
    %36 = vector.broadcast %cst_16 : f32 to vector<2x192xf32>
    %37 = arith.mulf %36, %35 : vector<2x192xf32>
    %cst_17 = arith.constant 5.000000e-01 : f32
    %38 = vector.broadcast %cst_17 : f32 to vector<2x192xf32>
    %39 = arith.addf %37, %38 : vector<2x192xf32>
    %40 = vector.extract_strided_slice %39 {offsets = [0, 0], sizes = [2, 64], strides = [1, 1]} : vector<2x192xf32> to vector<2x64xf32>
    %41 = vector.extract_strided_slice %39 {offsets = [0, 64], sizes = [2, 64], strides = [1, 1]} : vector<2x192xf32> to vector<2x64xf32>
    %42 = vector.extract_strided_slice %39 {offsets = [0, 128], sizes = [2, 64], strides = [1, 1]} : vector<2x192xf32> to vector<2x64xf32>
    %43 = vector.extract_strided_slice %31 {offsets = [0, 192], sizes = [2, 64], strides = [1, 1]} : vector<2x256xf32> to vector<2x64xf32>
    %44 = math.tanh %43 : vector<2x64xf32>
    %45 = arith.mulf %41, %0 : vector<2x64xf32>
    %46 = arith.mulf %40, %44 : vector<2x64xf32>
    %47 = arith.addf %45, %46 : vector<2x64xf32>
    %48 = math.tanh %47 : vector<2x64xf32>
    %49 = arith.mulf %42, %48 : vector<2x64xf32>
    %c1_i32 = arith.constant 1 : i32
    %50 = arith.index_cast %c1_i32 : i32 to index
    %c0_18 = arith.constant 0 : index
    %c0_19 = arith.constant 0 : index
    %51 = vector.load %arg0[%50, %c0_18, %c0_19] : memref<8x2x256xf32, #tpu.memory_space<vmem>>, vector<1x2x256xf32>
    %52 = vector.shape_cast %51 : vector<1x2x256xf32> to vector<2x256xf32>
    %c0_20 = arith.constant 0 : index
    %c0_21 = arith.constant 0 : index
    %53 = vector.load %arg1[%c0_20, %c0_21] : memref<64x256xf32, #tpu.memory_space<vmem>>, vector<64x256xf32>
    %cst_22 = arith.constant dense<0.000000e+00> : vector<2x256xf32>
    %54 = tpu.matmul %24, %53, %cst_22 {dimension_numbers = #tpu.dot_dimension_numbers<[1], [0], [0], [1], [0, 0, 1, 1], [], []>} : vector<2x64xf32>, vector<64x256xf32>, vector<2x256xf32> -> vector<2x256xf32>
    %55 = arith.addf %52, %54 : vector<2x256xf32>
    %56 = vector.extract_strided_slice %55 {offsets = [0, 0], sizes = [2, 192], strides = [1, 1]} : vector<2x256xf32> to vector<2x192xf32>
    %cst_23 = arith.constant 5.000000e-01 : f32
    %57 = vector.broadcast %cst_23 : f32 to vector<2x192xf32>
    %58 = arith.mulf %57, %56 : vector<2x192xf32>
    %59 = math.tanh %58 : vector<2x192xf32>
    %cst_24 = arith.constant 5.000000e-01 : f32
    %60 = vector.broadcast %cst_24 : f32 to vector<2x192xf32>
    %61 = arith.mulf %60, %59 : vector<2x192xf32>
    %cst_25 = arith.constant 5.000000e-01 : f32
    %62 = vector.broadcast %cst_25 : f32 to vector<2x192xf32>
    %63 = arith.addf %61, %62 : vector<2x192xf32>
    %64 = vector.extract_strided_slice %63 {offsets = [0, 0], sizes = [2, 64], strides = [1, 1]} : vector<2x192xf32> to vector<2x64xf32>
    %65 = vector.extract_strided_slice %63 {offsets = [0, 64], sizes = [2, 64], strides = [1, 1]} : vector<2x192xf32> to vector<2x64xf32>
    %66 = vector.extract_strided_slice %63 {offsets = [0, 128], sizes = [2, 64], strides = [1, 1]} : vector<2x192xf32> to vector<2x64xf32>
    %67 = vector.extract_strided_slice %55 {offsets = [0, 192], sizes = [2, 64], strides = [1, 1]} : vector<2x256xf32> to vector<2x64xf32>
    %68 = math.tanh %67 : vector<2x64xf32>
    %69 = arith.mulf %65, %22 : vector<2x64xf32>
    %70 = arith.mulf %64, %68 : vector<2x64xf32>
    %71 = arith.addf %69, %70 : vector<2x64xf32>
    %72 = math.tanh %71 : vector<2x64xf32>
    %73 = arith.mulf %66, %72 : vector<2x64xf32>
    %c0_26 = arith.constant 0 : index
    %c0_27 = arith.constant 0 : index
    %74 = vector.load %arg2[%c0_26, %c0_27] : memref<64x256xf32, #tpu.memory_space<vmem>>, vector<64x256xf32>
    %cst_28 = arith.constant dense<0.000000e+00> : vector<2x256xf32>
    %75 = tpu.matmul %73, %74, %cst_28 {dimension_numbers = #tpu.dot_dimension_numbers<[1], [0], [0], [1], [0, 0, 1, 1], [], []>} : vector<2x64xf32>, vector<64x256xf32>, vector<2x256xf32> -> vector<2x256xf32>
    %c0_29 = arith.constant 0 : index
    %c0_30 = arith.constant 0 : index
    %76 = vector.load %arg3[%c0_29, %c0_30] : memref<64x256xf32, #tpu.memory_space<vmem>>, vector<64x256xf32>
    %cst_31 = arith.constant dense<0.000000e+00> : vector<2x256xf32>
    %77 = tpu.matmul %49, %76, %cst_31 {dimension_numbers = #tpu.dot_dimension_numbers<[1], [0], [0], [1], [0, 0, 1, 1], [], []>} : vector<2x64xf32>, vector<64x256xf32>, vector<2x256xf32> -> vector<2x256xf32>
    %78 = arith.addf %75, %77 : vector<2x256xf32>
    %c0_32 = arith.constant 0 : index
    %c0_33 = arith.constant 0 : index
    %79 = vector.load %arg4[%c0_32, %c0_33] : memref<2x256xf32, #tpu.memory_space<vmem>>, vector<2x256xf32>
    %80 = arith.addf %78, %79 : vector<2x256xf32>
    %81 = vector.extract_strided_slice %80 {offsets = [0, 0], sizes = [2, 192], strides = [1, 1]} : vector<2x256xf32> to vector<2x192xf32>
    %cst_34 = arith.constant 5.000000e-01 : f32
    %82 = vector.broadcast %cst_34 : f32 to vector<2x192xf32>
    %83 = arith.mulf %82, %81 : vector<2x192xf32>
    %84 = math.tanh %83 : vector<2x192xf32>
    %cst_35 = arith.constant 5.000000e-01 : f32
    %85 = vector.broadcast %cst_35 : f32 to vector<2x192xf32>
    %86 = arith.mulf %85, %84 : vector<2x192xf32>
    %cst_36 = arith.constant 5.000000e-01 : f32
    %87 = vector.broadcast %cst_36 : f32 to vector<2x192xf32>
    %88 = arith.addf %86, %87 : vector<2x192xf32>
    %89 = vector.extract_strided_slice %88 {offsets = [0, 0], sizes = [2, 64], strides = [1, 1]} : vector<2x192xf32> to vector<2x64xf32>
    %90 = vector.extract_strided_slice %88 {offsets = [0, 64], sizes = [2, 64], strides = [1, 1]} : vector<2x192xf32> to vector<2x64xf32>
    %91 = vector.extract_strided_slice %88 {offsets = [0, 128], sizes = [2, 64], strides = [1, 1]} : vector<2x192xf32> to vector<2x64xf32>
    %92 = vector.extract_strided_slice %80 {offsets = [0, 192], sizes = [2, 64], strides = [1, 1]} : vector<2x256xf32> to vector<2x64xf32>
    %93 = math.tanh %92 : vector<2x64xf32>
    %94 = arith.mulf %90, %47 : vector<2x64xf32>
    %95 = arith.mulf %89, %93 : vector<2x64xf32>
    %96 = arith.addf %94, %95 : vector<2x64xf32>
    %97 = math.tanh %96 : vector<2x64xf32>
    %98 = arith.mulf %91, %97 : vector<2x64xf32>
    %c2_i32 = arith.constant 2 : i32
    %99 = arith.index_cast %c2_i32 : i32 to index
    %c0_37 = arith.constant 0 : index
    %c0_38 = arith.constant 0 : index
    %100 = vector.load %arg0[%99, %c0_37, %c0_38] : memref<8x2x256xf32, #tpu.memory_space<vmem>>, vector<1x2x256xf32>
    %101 = vector.shape_cast %100 : vector<1x2x256xf32> to vector<2x256xf32>
    %c0_39 = arith.constant 0 : index
    %c0_40 = arith.constant 0 : index
    %102 = vector.load %arg1[%c0_39, %c0_40] : memref<64x256xf32, #tpu.memory_space<vmem>>, vector<64x256xf32>
    %cst_41 = arith.constant dense<0.000000e+00> : vector<2x256xf32>
    %103 = tpu.matmul %73, %102, %cst_41 {dimension_numbers = #tpu.dot_dimension_numbers<[1], [0], [0], [1], [0, 0, 1, 1], [], []>} : vector<2x64xf32>, vector<64x256xf32>, vector<2x256xf32> -> vector<2x256xf32>
    %104 = arith.addf %101, %103 : vector<2x256xf32>
    %105 = vector.extract_strided_slice %104 {offsets = [0, 0], sizes = [2, 192], strides = [1, 1]} : vector<2x256xf32> to vector<2x192xf32>
    %cst_42 = arith.constant 5.000000e-01 : f32
    %106 = vector.broadcast %cst_42 : f32 to vector<2x192xf32>
    %107 = arith.mulf %106, %105 : vector<2x192xf32>
    %108 = math.tanh %107 : vector<2x192xf32>
    %cst_43 = arith.constant 5.000000e-01 : f32
    %109 = vector.broadcast %cst_43 : f32 to vector<2x192xf32>
    %110 = arith.mulf %109, %108 : vector<2x192xf32>
    %cst_44 = arith.constant 5.000000e-01 : f32
    %111 = vector.broadcast %cst_44 : f32 to vector<2x192xf32>
    %112 = arith.addf %110, %111 : vector<2x192xf32>
    %113 = vector.extract_strided_slice %112 {offsets = [0, 0], sizes = [2, 64], strides = [1, 1]} : vector<2x192xf32> to vector<2x64xf32>
    %114 = vector.extract_strided_slice %112 {offsets = [0, 64], sizes = [2, 64], strides = [1, 1]} : vector<2x192xf32> to vector<2x64xf32>
    %115 = vector.extract_strided_slice %112 {offsets = [0, 128], sizes = [2, 64], strides = [1, 1]} : vector<2x192xf32> to vector<2x64xf32>
    %116 = vector.extract_strided_slice %104 {offsets = [0, 192], sizes = [2, 64], strides = [1, 1]} : vector<2x256xf32> to vector<2x64xf32>
    %117 = math.tanh %116 : vector<2x64xf32>
    %118 = arith.mulf %114, %71 : vector<2x64xf32>
    %119 = arith.mulf %113, %117 : vector<2x64xf32>
    %120 = arith.addf %118, %119 : vector<2x64xf32>
    %121 = math.tanh %120 : vector<2x64xf32>
    %122 = arith.mulf %115, %121 : vector<2x64xf32>
    %c0_45 = arith.constant 0 : index
    %c0_46 = arith.constant 0 : index
    %123 = vector.load %arg2[%c0_45, %c0_46] : memref<64x256xf32, #tpu.memory_space<vmem>>, vector<64x256xf32>
    %cst_47 = arith.constant dense<0.000000e+00> : vector<2x256xf32>
    %124 = tpu.matmul %122, %123, %cst_47 {dimension_numbers = #tpu.dot_dimension_numbers<[1], [0], [0], [1], [0, 0, 1, 1], [], []>} : vector<2x64xf32>, vector<64x256xf32>, vector<2x256xf32> -> vector<2x256xf32>
    %c0_48 = arith.constant 0 : index
    %c0_49 = arith.constant 0 : index
    %125 = vector.load %arg3[%c0_48, %c0_49] : memref<64x256xf32, #tpu.memory_space<vmem>>, vector<64x256xf32>
    %cst_50 = arith.constant dense<0.000000e+00> : vector<2x256xf32>
    %126 = tpu.matmul %98, %125, %cst_50 {dimension_numbers = #tpu.dot_dimension_numbers<[1], [0], [0], [1], [0, 0, 1, 1], [], []>} : vector<2x64xf32>, vector<64x256xf32>, vector<2x256xf32> -> vector<2x256xf32>
    %127 = arith.addf %124, %126 : vector<2x256xf32>
    %c0_51 = arith.constant 0 : index
    %c0_52 = arith.constant 0 : index
    %128 = vector.load %arg4[%c0_51, %c0_52] : memref<2x256xf32, #tpu.memory_space<vmem>>, vector<2x256xf32>
    %129 = arith.addf %127, %128 : vector<2x256xf32>
    %130 = vector.extract_strided_slice %129 {offsets = [0, 0], sizes = [2, 192], strides = [1, 1]} : vector<2x256xf32> to vector<2x192xf32>
    %cst_53 = arith.constant 5.000000e-01 : f32
    %131 = vector.broadcast %cst_53 : f32 to vector<2x192xf32>
    %132 = arith.mulf %131, %130 : vector<2x192xf32>
    %133 = math.tanh %132 : vector<2x192xf32>
    %cst_54 = arith.constant 5.000000e-01 : f32
    %134 = vector.broadcast %cst_54 : f32 to vector<2x192xf32>
    %135 = arith.mulf %134, %133 : vector<2x192xf32>
    %cst_55 = arith.constant 5.000000e-01 : f32
    %136 = vector.broadcast %cst_55 : f32 to vector<2x192xf32>
    %137 = arith.addf %135, %136 : vector<2x192xf32>
    %138 = vector.extract_strided_slice %137 {offsets = [0, 0], sizes = [2, 64], strides = [1, 1]} : vector<2x192xf32> to vector<2x64xf32>
    %139 = vector.extract_strided_slice %137 {offsets = [0, 64], sizes = [2, 64], strides = [1, 1]} : vector<2x192xf32> to vector<2x64xf32>
    %140 = vector.extract_strided_slice %137 {offsets = [0, 128], sizes = [2, 64], strides = [1, 1]} : vector<2x192xf32> to vector<2x64xf32>
    %141 = vector.extract_strided_slice %129 {offsets = [0, 192], sizes = [2, 64], strides = [1, 1]} : vector<2x256xf32> to vector<2x64xf32>
    %142 = math.tanh %141 : vector<2x64xf32>
    %143 = arith.mulf %139, %96 : vector<2x64xf32>
    %144 = arith.mulf %138, %142 : vector<2x64xf32>
    %145 = arith.addf %143, %144 : vector<2x64xf32>
    %146 = math.tanh %145 : vector<2x64xf32>
    %147 = arith.mulf %140, %146 : vector<2x64xf32>
    %c3_i32 = arith.constant 3 : i32
    %148 = arith.index_cast %c3_i32 : i32 to index
    %c0_56 = arith.constant 0 : index
    %c0_57 = arith.constant 0 : index
    %149 = vector.load %arg0[%148, %c0_56, %c0_57] : memref<8x2x256xf32, #tpu.memory_space<vmem>>, vector<1x2x256xf32>
    %150 = vector.shape_cast %149 : vector<1x2x256xf32> to vector<2x256xf32>
    %c0_58 = arith.constant 0 : index
    %c0_59 = arith.constant 0 : index
    %151 = vector.load %arg1[%c0_58, %c0_59] : memref<64x256xf32, #tpu.memory_space<vmem>>, vector<64x256xf32>
    %cst_60 = arith.constant dense<0.000000e+00> : vector<2x256xf32>
    %152 = tpu.matmul %122, %151, %cst_60 {dimension_numbers = #tpu.dot_dimension_numbers<[1], [0], [0], [1], [0, 0, 1, 1], [], []>} : vector<2x64xf32>, vector<64x256xf32>, vector<2x256xf32> -> vector<2x256xf32>
    %153 = arith.addf %150, %152 : vector<2x256xf32>
    %154 = vector.extract_strided_slice %153 {offsets = [0, 0], sizes = [2, 192], strides = [1, 1]} : vector<2x256xf32> to vector<2x192xf32>
    %cst_61 = arith.constant 5.000000e-01 : f32
    %155 = vector.broadcast %cst_61 : f32 to vector<2x192xf32>
    %156 = arith.mulf %155, %154 : vector<2x192xf32>
    %157 = math.tanh %156 : vector<2x192xf32>
    %cst_62 = arith.constant 5.000000e-01 : f32
    %158 = vector.broadcast %cst_62 : f32 to vector<2x192xf32>
    %159 = arith.mulf %158, %157 : vector<2x192xf32>
    %cst_63 = arith.constant 5.000000e-01 : f32
    %160 = vector.broadcast %cst_63 : f32 to vector<2x192xf32>
    %161 = arith.addf %159, %160 : vector<2x192xf32>
    %162 = vector.extract_strided_slice %161 {offsets = [0, 0], sizes = [2, 64], strides = [1, 1]} : vector<2x192xf32> to vector<2x64xf32>
    %163 = vector.extract_strided_slice %161 {offsets = [0, 64], sizes = [2, 64], strides = [1, 1]} : vector<2x192xf32> to vector<2x64xf32>
    %164 = vector.extract_strided_slice %161 {offsets = [0, 128], sizes = [2, 64], strides = [1, 1]} : vector<2x192xf32> to vector<2x64xf32>
    %165 = vector.extract_strided_slice %153 {offsets = [0, 192], sizes = [2, 64], strides = [1, 1]} : vector<2x256xf32> to vector<2x64xf32>
    %166 = math.tanh %165 : vector<2x64xf32>
    %167 = arith.mulf %163, %120 : vector<2x64xf32>
    %168 = arith.mulf %162, %166 : vector<2x64xf32>
    %169 = arith.addf %167, %168 : vector<2x64xf32>
    %170 = math.tanh %169 : vector<2x64xf32>
    %171 = arith.mulf %164, %170 : vector<2x64xf32>
    %c0_64 = arith.constant 0 : index
    %c0_65 = arith.constant 0 : index
    %172 = vector.load %arg2[%c0_64, %c0_65] : memref<64x256xf32, #tpu.memory_space<vmem>>, vector<64x256xf32>
    %cst_66 = arith.constant dense<0.000000e+00> : vector<2x256xf32>
    %173 = tpu.matmul %171, %172, %cst_66 {dimension_numbers = #tpu.dot_dimension_numbers<[1], [0], [0], [1], [0, 0, 1, 1], [], []>} : vector<2x64xf32>, vector<64x256xf32>, vector<2x256xf32> -> vector<2x256xf32>
    %c0_67 = arith.constant 0 : index
    %c0_68 = arith.constant 0 : index
    %174 = vector.load %arg3[%c0_67, %c0_68] : memref<64x256xf32, #tpu.memory_space<vmem>>, vector<64x256xf32>
    %cst_69 = arith.constant dense<0.000000e+00> : vector<2x256xf32>
    %175 = tpu.matmul %147, %174, %cst_69 {dimension_numbers = #tpu.dot_dimension_numbers<[1], [0], [0], [1], [0, 0, 1, 1], [], []>} : vector<2x64xf32>, vector<64x256xf32>, vector<2x256xf32> -> vector<2x256xf32>
    %176 = arith.addf %173, %175 : vector<2x256xf32>
    %c0_70 = arith.constant 0 : index
    %c0_71 = arith.constant 0 : index
    %177 = vector.load %arg4[%c0_70, %c0_71] : memref<2x256xf32, #tpu.memory_space<vmem>>, vector<2x256xf32>
    %178 = arith.addf %176, %177 : vector<2x256xf32>
    %179 = vector.extract_strided_slice %178 {offsets = [0, 0], sizes = [2, 192], strides = [1, 1]} : vector<2x256xf32> to vector<2x192xf32>
    %cst_72 = arith.constant 5.000000e-01 : f32
    %180 = vector.broadcast %cst_72 : f32 to vector<2x192xf32>
    %181 = arith.mulf %180, %179 : vector<2x192xf32>
    %182 = math.tanh %181 : vector<2x192xf32>
    %cst_73 = arith.constant 5.000000e-01 : f32
    %183 = vector.broadcast %cst_73 : f32 to vector<2x192xf32>
    %184 = arith.mulf %183, %182 : vector<2x192xf32>
    %cst_74 = arith.constant 5.000000e-01 : f32
    %185 = vector.broadcast %cst_74 : f32 to vector<2x192xf32>
    %186 = arith.addf %184, %185 : vector<2x192xf32>
    %187 = vector.extract_strided_slice %186 {offsets = [0, 0], sizes = [2, 64], strides = [1, 1]} : vector<2x192xf32> to vector<2x64xf32>
    %188 = vector.extract_strided_slice %186 {offsets = [0, 64], sizes = [2, 64], strides = [1, 1]} : vector<2x192xf32> to vector<2x64xf32>
    %189 = vector.extract_strided_slice %186 {offsets = [0, 128], sizes = [2, 64], strides = [1, 1]} : vector<2x192xf32> to vector<2x64xf32>
    %190 = vector.extract_strided_slice %178 {offsets = [0, 192], sizes = [2, 64], strides = [1, 1]} : vector<2x256xf32> to vector<2x64xf32>
    %191 = math.tanh %190 : vector<2x64xf32>
    %192 = arith.mulf %188, %145 : vector<2x64xf32>
    %193 = arith.mulf %187, %191 : vector<2x64xf32>
    %194 = arith.addf %192, %193 : vector<2x64xf32>
    %195 = math.tanh %194 : vector<2x64xf32>
    %196 = arith.mulf %189, %195 : vector<2x64xf32>
    %c4_i32 = arith.constant 4 : i32
    %197 = arith.index_cast %c4_i32 : i32 to index
    %c0_75 = arith.constant 0 : index
    %c0_76 = arith.constant 0 : index
    %198 = vector.load %arg0[%197, %c0_75, %c0_76] : memref<8x2x256xf32, #tpu.memory_space<vmem>>, vector<1x2x256xf32>
    %199 = vector.shape_cast %198 : vector<1x2x256xf32> to vector<2x256xf32>
    %c0_77 = arith.constant 0 : index
    %c0_78 = arith.constant 0 : index
    %200 = vector.load %arg1[%c0_77, %c0_78] : memref<64x256xf32, #tpu.memory_space<vmem>>, vector<64x256xf32>
    %cst_79 = arith.constant dense<0.000000e+00> : vector<2x256xf32>
    %201 = tpu.matmul %171, %200, %cst_79 {dimension_numbers = #tpu.dot_dimension_numbers<[1], [0], [0], [1], [0, 0, 1, 1], [], []>} : vector<2x64xf32>, vector<64x256xf32>, vector<2x256xf32> -> vector<2x256xf32>
    %202 = arith.addf %199, %201 : vector<2x256xf32>
    %203 = vector.extract_strided_slice %202 {offsets = [0, 0], sizes = [2, 192], strides = [1, 1]} : vector<2x256xf32> to vector<2x192xf32>
    %cst_80 = arith.constant 5.000000e-01 : f32
    %204 = vector.broadcast %cst_80 : f32 to vector<2x192xf32>
    %205 = arith.mulf %204, %203 : vector<2x192xf32>
    %206 = math.tanh %205 : vector<2x192xf32>
    %cst_81 = arith.constant 5.000000e-01 : f32
    %207 = vector.broadcast %cst_81 : f32 to vector<2x192xf32>
    %208 = arith.mulf %207, %206 : vector<2x192xf32>
    %cst_82 = arith.constant 5.000000e-01 : f32
    %209 = vector.broadcast %cst_82 : f32 to vector<2x192xf32>
    %210 = arith.addf %208, %209 : vector<2x192xf32>
    %211 = vector.extract_strided_slice %210 {offsets = [0, 0], sizes = [2, 64], strides = [1, 1]} : vector<2x192xf32> to vector<2x64xf32>
    %212 = vector.extract_strided_slice %210 {offsets = [0, 64], sizes = [2, 64], strides = [1, 1]} : vector<2x192xf32> to vector<2x64xf32>
    %213 = vector.extract_strided_slice %210 {offsets = [0, 128], sizes = [2, 64], strides = [1, 1]} : vector<2x192xf32> to vector<2x64xf32>
    %214 = vector.extract_strided_slice %202 {offsets = [0, 192], sizes = [2, 64], strides = [1, 1]} : vector<2x256xf32> to vector<2x64xf32>
    %215 = math.tanh %214 : vector<2x64xf32>
    %216 = arith.mulf %212, %169 : vector<2x64xf32>
    %217 = arith.mulf %211, %215 : vector<2x64xf32>
    %218 = arith.addf %216, %217 : vector<2x64xf32>
    %219 = math.tanh %218 : vector<2x64xf32>
    %220 = arith.mulf %213, %219 : vector<2x64xf32>
    %c0_83 = arith.constant 0 : index
    %c0_84 = arith.constant 0 : index
    %221 = vector.load %arg2[%c0_83, %c0_84] : memref<64x256xf32, #tpu.memory_space<vmem>>, vector<64x256xf32>
    %cst_85 = arith.constant dense<0.000000e+00> : vector<2x256xf32>
    %222 = tpu.matmul %220, %221, %cst_85 {dimension_numbers = #tpu.dot_dimension_numbers<[1], [0], [0], [1], [0, 0, 1, 1], [], []>} : vector<2x64xf32>, vector<64x256xf32>, vector<2x256xf32> -> vector<2x256xf32>
    %c0_86 = arith.constant 0 : index
    %c0_87 = arith.constant 0 : index
    %223 = vector.load %arg3[%c0_86, %c0_87] : memref<64x256xf32, #tpu.memory_space<vmem>>, vector<64x256xf32>
    %cst_88 = arith.constant dense<0.000000e+00> : vector<2x256xf32>
    %224 = tpu.matmul %196, %223, %cst_88 {dimension_numbers = #tpu.dot_dimension_numbers<[1], [0], [0], [1], [0, 0, 1, 1], [], []>} : vector<2x64xf32>, vector<64x256xf32>, vector<2x256xf32> -> vector<2x256xf32>
    %225 = arith.addf %222, %224 : vector<2x256xf32>
    %c0_89 = arith.constant 0 : index
    %c0_90 = arith.constant 0 : index
    %226 = vector.load %arg4[%c0_89, %c0_90] : memref<2x256xf32, #tpu.memory_space<vmem>>, vector<2x256xf32>
    %227 = arith.addf %225, %226 : vector<2x256xf32>
    %228 = vector.extract_strided_slice %227 {offsets = [0, 0], sizes = [2, 192], strides = [1, 1]} : vector<2x256xf32> to vector<2x192xf32>
    %cst_91 = arith.constant 5.000000e-01 : f32
    %229 = vector.broadcast %cst_91 : f32 to vector<2x192xf32>
    %230 = arith.mulf %229, %228 : vector<2x192xf32>
    %231 = math.tanh %230 : vector<2x192xf32>
    %cst_92 = arith.constant 5.000000e-01 : f32
    %232 = vector.broadcast %cst_92 : f32 to vector<2x192xf32>
    %233 = arith.mulf %232, %231 : vector<2x192xf32>
    %cst_93 = arith.constant 5.000000e-01 : f32
    %234 = vector.broadcast %cst_93 : f32 to vector<2x192xf32>
    %235 = arith.addf %233, %234 : vector<2x192xf32>
    %236 = vector.extract_strided_slice %235 {offsets = [0, 0], sizes = [2, 64], strides = [1, 1]} : vector<2x192xf32> to vector<2x64xf32>
    %237 = vector.extract_strided_slice %235 {offsets = [0, 64], sizes = [2, 64], strides = [1, 1]} : vector<2x192xf32> to vector<2x64xf32>
    %238 = vector.extract_strided_slice %235 {offsets = [0, 128], sizes = [2, 64], strides = [1, 1]} : vector<2x192xf32> to vector<2x64xf32>
    %239 = vector.extract_strided_slice %227 {offsets = [0, 192], sizes = [2, 64], strides = [1, 1]} : vector<2x256xf32> to vector<2x64xf32>
    %240 = math.tanh %239 : vector<2x64xf32>
    %241 = arith.mulf %237, %194 : vector<2x64xf32>
    %242 = arith.mulf %236, %240 : vector<2x64xf32>
    %243 = arith.addf %241, %242 : vector<2x64xf32>
    %244 = math.tanh %243 : vector<2x64xf32>
    %245 = arith.mulf %238, %244 : vector<2x64xf32>
    %c5_i32 = arith.constant 5 : i32
    %246 = arith.index_cast %c5_i32 : i32 to index
    %c0_94 = arith.constant 0 : index
    %c0_95 = arith.constant 0 : index
    %247 = vector.load %arg0[%246, %c0_94, %c0_95] : memref<8x2x256xf32, #tpu.memory_space<vmem>>, vector<1x2x256xf32>
    %248 = vector.shape_cast %247 : vector<1x2x256xf32> to vector<2x256xf32>
    %c0_96 = arith.constant 0 : index
    %c0_97 = arith.constant 0 : index
    %249 = vector.load %arg1[%c0_96, %c0_97] : memref<64x256xf32, #tpu.memory_space<vmem>>, vector<64x256xf32>
    %cst_98 = arith.constant dense<0.000000e+00> : vector<2x256xf32>
    %250 = tpu.matmul %220, %249, %cst_98 {dimension_numbers = #tpu.dot_dimension_numbers<[1], [0], [0], [1], [0, 0, 1, 1], [], []>} : vector<2x64xf32>, vector<64x256xf32>, vector<2x256xf32> -> vector<2x256xf32>
    %251 = arith.addf %248, %250 : vector<2x256xf32>
    %252 = vector.extract_strided_slice %251 {offsets = [0, 0], sizes = [2, 192], strides = [1, 1]} : vector<2x256xf32> to vector<2x192xf32>
    %cst_99 = arith.constant 5.000000e-01 : f32
    %253 = vector.broadcast %cst_99 : f32 to vector<2x192xf32>
    %254 = arith.mulf %253, %252 : vector<2x192xf32>
    %255 = math.tanh %254 : vector<2x192xf32>
    %cst_100 = arith.constant 5.000000e-01 : f32
    %256 = vector.broadcast %cst_100 : f32 to vector<2x192xf32>
    %257 = arith.mulf %256, %255 : vector<2x192xf32>
    %cst_101 = arith.constant 5.000000e-01 : f32
    %258 = vector.broadcast %cst_101 : f32 to vector<2x192xf32>
    %259 = arith.addf %257, %258 : vector<2x192xf32>
    %260 = vector.extract_strided_slice %259 {offsets = [0, 0], sizes = [2, 64], strides = [1, 1]} : vector<2x192xf32> to vector<2x64xf32>
    %261 = vector.extract_strided_slice %259 {offsets = [0, 64], sizes = [2, 64], strides = [1, 1]} : vector<2x192xf32> to vector<2x64xf32>
    %262 = vector.extract_strided_slice %259 {offsets = [0, 128], sizes = [2, 64], strides = [1, 1]} : vector<2x192xf32> to vector<2x64xf32>
    %263 = vector.extract_strided_slice %251 {offsets = [0, 192], sizes = [2, 64], strides = [1, 1]} : vector<2x256xf32> to vector<2x64xf32>
    %264 = math.tanh %263 : vector<2x64xf32>
    %265 = arith.mulf %261, %218 : vector<2x64xf32>
    %266 = arith.mulf %260, %264 : vector<2x64xf32>
    %267 = arith.addf %265, %266 : vector<2x64xf32>
    %268 = math.tanh %267 : vector<2x64xf32>
    %269 = arith.mulf %262, %268 : vector<2x64xf32>
    %c0_102 = arith.constant 0 : index
    %c0_103 = arith.constant 0 : index
    %270 = vector.load %arg2[%c0_102, %c0_103] : memref<64x256xf32, #tpu.memory_space<vmem>>, vector<64x256xf32>
    %cst_104 = arith.constant dense<0.000000e+00> : vector<2x256xf32>
    %271 = tpu.matmul %269, %270, %cst_104 {dimension_numbers = #tpu.dot_dimension_numbers<[1], [0], [0], [1], [0, 0, 1, 1], [], []>} : vector<2x64xf32>, vector<64x256xf32>, vector<2x256xf32> -> vector<2x256xf32>
    %c0_105 = arith.constant 0 : index
    %c0_106 = arith.constant 0 : index
    %272 = vector.load %arg3[%c0_105, %c0_106] : memref<64x256xf32, #tpu.memory_space<vmem>>, vector<64x256xf32>
    %cst_107 = arith.constant dense<0.000000e+00> : vector<2x256xf32>
    %273 = tpu.matmul %245, %272, %cst_107 {dimension_numbers = #tpu.dot_dimension_numbers<[1], [0], [0], [1], [0, 0, 1, 1], [], []>} : vector<2x64xf32>, vector<64x256xf32>, vector<2x256xf32> -> vector<2x256xf32>
    %274 = arith.addf %271, %273 : vector<2x256xf32>
    %c0_108 = arith.constant 0 : index
    %c0_109 = arith.constant 0 : index
    %275 = vector.load %arg4[%c0_108, %c0_109] : memref<2x256xf32, #tpu.memory_space<vmem>>, vector<2x256xf32>
    %276 = arith.addf %274, %275 : vector<2x256xf32>
    %277 = vector.extract_strided_slice %276 {offsets = [0, 0], sizes = [2, 192], strides = [1, 1]} : vector<2x256xf32> to vector<2x192xf32>
    %cst_110 = arith.constant 5.000000e-01 : f32
    %278 = vector.broadcast %cst_110 : f32 to vector<2x192xf32>
    %279 = arith.mulf %278, %277 : vector<2x192xf32>
    %280 = math.tanh %279 : vector<2x192xf32>
    %cst_111 = arith.constant 5.000000e-01 : f32
    %281 = vector.broadcast %cst_111 : f32 to vector<2x192xf32>
    %282 = arith.mulf %281, %280 : vector<2x192xf32>
    %cst_112 = arith.constant 5.000000e-01 : f32
    %283 = vector.broadcast %cst_112 : f32 to vector<2x192xf32>
    %284 = arith.addf %282, %283 : vector<2x192xf32>
    %285 = vector.extract_strided_slice %284 {offsets = [0, 0], sizes = [2, 64], strides = [1, 1]} : vector<2x192xf32> to vector<2x64xf32>
    %286 = vector.extract_strided_slice %284 {offsets = [0, 64], sizes = [2, 64], strides = [1, 1]} : vector<2x192xf32> to vector<2x64xf32>
    %287 = vector.extract_strided_slice %284 {offsets = [0, 128], sizes = [2, 64], strides = [1, 1]} : vector<2x192xf32> to vector<2x64xf32>
    %288 = vector.extract_strided_slice %276 {offsets = [0, 192], sizes = [2, 64], strides = [1, 1]} : vector<2x256xf32> to vector<2x64xf32>
    %289 = math.tanh %288 : vector<2x64xf32>
    %290 = arith.mulf %286, %243 : vector<2x64xf32>
    %291 = arith.mulf %285, %289 : vector<2x64xf32>
    %292 = arith.addf %290, %291 : vector<2x64xf32>
    %293 = math.tanh %292 : vector<2x64xf32>
    %294 = arith.mulf %287, %293 : vector<2x64xf32>
    %c6_i32 = arith.constant 6 : i32
    %295 = arith.index_cast %c6_i32 : i32 to index
    %c0_113 = arith.constant 0 : index
    %c0_114 = arith.constant 0 : index
    %296 = vector.load %arg0[%295, %c0_113, %c0_114] : memref<8x2x256xf32, #tpu.memory_space<vmem>>, vector<1x2x256xf32>
    %297 = vector.shape_cast %296 : vector<1x2x256xf32> to vector<2x256xf32>
    %c0_115 = arith.constant 0 : index
    %c0_116 = arith.constant 0 : index
    %298 = vector.load %arg1[%c0_115, %c0_116] : memref<64x256xf32, #tpu.memory_space<vmem>>, vector<64x256xf32>
    %cst_117 = arith.constant dense<0.000000e+00> : vector<2x256xf32>
    %299 = tpu.matmul %269, %298, %cst_117 {dimension_numbers = #tpu.dot_dimension_numbers<[1], [0], [0], [1], [0, 0, 1, 1], [], []>} : vector<2x64xf32>, vector<64x256xf32>, vector<2x256xf32> -> vector<2x256xf32>
    %300 = arith.addf %297, %299 : vector<2x256xf32>
    %301 = vector.extract_strided_slice %300 {offsets = [0, 0], sizes = [2, 192], strides = [1, 1]} : vector<2x256xf32> to vector<2x192xf32>
    %cst_118 = arith.constant 5.000000e-01 : f32
    %302 = vector.broadcast %cst_118 : f32 to vector<2x192xf32>
    %303 = arith.mulf %302, %301 : vector<2x192xf32>
    %304 = math.tanh %303 : vector<2x192xf32>
    %cst_119 = arith.constant 5.000000e-01 : f32
    %305 = vector.broadcast %cst_119 : f32 to vector<2x192xf32>
    %306 = arith.mulf %305, %304 : vector<2x192xf32>
    %cst_120 = arith.constant 5.000000e-01 : f32
    %307 = vector.broadcast %cst_120 : f32 to vector<2x192xf32>
    %308 = arith.addf %306, %307 : vector<2x192xf32>
    %309 = vector.extract_strided_slice %308 {offsets = [0, 0], sizes = [2, 64], strides = [1, 1]} : vector<2x192xf32> to vector<2x64xf32>
    %310 = vector.extract_strided_slice %308 {offsets = [0, 64], sizes = [2, 64], strides = [1, 1]} : vector<2x192xf32> to vector<2x64xf32>
    %311 = vector.extract_strided_slice %308 {offsets = [0, 128], sizes = [2, 64], strides = [1, 1]} : vector<2x192xf32> to vector<2x64xf32>
    %312 = vector.extract_strided_slice %300 {offsets = [0, 192], sizes = [2, 64], strides = [1, 1]} : vector<2x256xf32> to vector<2x64xf32>
    %313 = math.tanh %312 : vector<2x64xf32>
    %314 = arith.mulf %310, %267 : vector<2x64xf32>
    %315 = arith.mulf %309, %313 : vector<2x64xf32>
    %316 = arith.addf %314, %315 : vector<2x64xf32>
    %317 = math.tanh %316 : vector<2x64xf32>
    %318 = arith.mulf %311, %317 : vector<2x64xf32>
    %c0_121 = arith.constant 0 : index
    %c0_122 = arith.constant 0 : index
    %319 = vector.load %arg2[%c0_121, %c0_122] : memref<64x256xf32, #tpu.memory_space<vmem>>, vector<64x256xf32>
    %cst_123 = arith.constant dense<0.000000e+00> : vector<2x256xf32>
    %320 = tpu.matmul %318, %319, %cst_123 {dimension_numbers = #tpu.dot_dimension_numbers<[1], [0], [0], [1], [0, 0, 1, 1], [], []>} : vector<2x64xf32>, vector<64x256xf32>, vector<2x256xf32> -> vector<2x256xf32>
    %c0_124 = arith.constant 0 : index
    %c0_125 = arith.constant 0 : index
    %321 = vector.load %arg3[%c0_124, %c0_125] : memref<64x256xf32, #tpu.memory_space<vmem>>, vector<64x256xf32>
    %cst_126 = arith.constant dense<0.000000e+00> : vector<2x256xf32>
    %322 = tpu.matmul %294, %321, %cst_126 {dimension_numbers = #tpu.dot_dimension_numbers<[1], [0], [0], [1], [0, 0, 1, 1], [], []>} : vector<2x64xf32>, vector<64x256xf32>, vector<2x256xf32> -> vector<2x256xf32>
    %323 = arith.addf %320, %322 : vector<2x256xf32>
    %c0_127 = arith.constant 0 : index
    %c0_128 = arith.constant 0 : index
    %324 = vector.load %arg4[%c0_127, %c0_128] : memref<2x256xf32, #tpu.memory_space<vmem>>, vector<2x256xf32>
    %325 = arith.addf %323, %324 : vector<2x256xf32>
    %326 = vector.extract_strided_slice %325 {offsets = [0, 0], sizes = [2, 192], strides = [1, 1]} : vector<2x256xf32> to vector<2x192xf32>
    %cst_129 = arith.constant 5.000000e-01 : f32
    %327 = vector.broadcast %cst_129 : f32 to vector<2x192xf32>
    %328 = arith.mulf %327, %326 : vector<2x192xf32>
    %329 = math.tanh %328 : vector<2x192xf32>
    %cst_130 = arith.constant 5.000000e-01 : f32
    %330 = vector.broadcast %cst_130 : f32 to vector<2x192xf32>
    %331 = arith.mulf %330, %329 : vector<2x192xf32>
    %cst_131 = arith.constant 5.000000e-01 : f32
    %332 = vector.broadcast %cst_131 : f32 to vector<2x192xf32>
    %333 = arith.addf %331, %332 : vector<2x192xf32>
    %334 = vector.extract_strided_slice %333 {offsets = [0, 0], sizes = [2, 64], strides = [1, 1]} : vector<2x192xf32> to vector<2x64xf32>
    %335 = vector.extract_strided_slice %333 {offsets = [0, 64], sizes = [2, 64], strides = [1, 1]} : vector<2x192xf32> to vector<2x64xf32>
    %336 = vector.extract_strided_slice %333 {offsets = [0, 128], sizes = [2, 64], strides = [1, 1]} : vector<2x192xf32> to vector<2x64xf32>
    %337 = vector.extract_strided_slice %325 {offsets = [0, 192], sizes = [2, 64], strides = [1, 1]} : vector<2x256xf32> to vector<2x64xf32>
    %338 = math.tanh %337 : vector<2x64xf32>
    %339 = arith.mulf %335, %292 : vector<2x64xf32>
    %340 = arith.mulf %334, %338 : vector<2x64xf32>
    %341 = arith.addf %339, %340 : vector<2x64xf32>
    %342 = math.tanh %341 : vector<2x64xf32>
    %343 = arith.mulf %336, %342 : vector<2x64xf32>
    %c7_i32 = arith.constant 7 : i32
    %344 = arith.index_cast %c7_i32 : i32 to index
    %c0_132 = arith.constant 0 : index
    %c0_133 = arith.constant 0 : index
    %345 = vector.load %arg0[%344, %c0_132, %c0_133] : memref<8x2x256xf32, #tpu.memory_space<vmem>>, vector<1x2x256xf32>
    %346 = vector.shape_cast %345 : vector<1x2x256xf32> to vector<2x256xf32>
    %c0_134 = arith.constant 0 : index
    %c0_135 = arith.constant 0 : index
    %347 = vector.load %arg1[%c0_134, %c0_135] : memref<64x256xf32, #tpu.memory_space<vmem>>, vector<64x256xf32>
    %cst_136 = arith.constant dense<0.000000e+00> : vector<2x256xf32>
    %348 = tpu.matmul %318, %347, %cst_136 {dimension_numbers = #tpu.dot_dimension_numbers<[1], [0], [0], [1], [0, 0, 1, 1], [], []>} : vector<2x64xf32>, vector<64x256xf32>, vector<2x256xf32> -> vector<2x256xf32>
    %349 = arith.addf %346, %348 : vector<2x256xf32>
    %350 = vector.extract_strided_slice %349 {offsets = [0, 0], sizes = [2, 192], strides = [1, 1]} : vector<2x256xf32> to vector<2x192xf32>
    %cst_137 = arith.constant 5.000000e-01 : f32
    %351 = vector.broadcast %cst_137 : f32 to vector<2x192xf32>
    %352 = arith.mulf %351, %350 : vector<2x192xf32>
    %353 = math.tanh %352 : vector<2x192xf32>
    %cst_138 = arith.constant 5.000000e-01 : f32
    %354 = vector.broadcast %cst_138 : f32 to vector<2x192xf32>
    %355 = arith.mulf %354, %353 : vector<2x192xf32>
    %cst_139 = arith.constant 5.000000e-01 : f32
    %356 = vector.broadcast %cst_139 : f32 to vector<2x192xf32>
    %357 = arith.addf %355, %356 : vector<2x192xf32>
    %358 = vector.extract_strided_slice %357 {offsets = [0, 0], sizes = [2, 64], strides = [1, 1]} : vector<2x192xf32> to vector<2x64xf32>
    %359 = vector.extract_strided_slice %357 {offsets = [0, 64], sizes = [2, 64], strides = [1, 1]} : vector<2x192xf32> to vector<2x64xf32>
    %360 = vector.extract_strided_slice %357 {offsets = [0, 128], sizes = [2, 64], strides = [1, 1]} : vector<2x192xf32> to vector<2x64xf32>
    %361 = vector.extract_strided_slice %349 {offsets = [0, 192], sizes = [2, 64], strides = [1, 1]} : vector<2x256xf32> to vector<2x64xf32>
    %362 = math.tanh %361 : vector<2x64xf32>
    %363 = arith.mulf %359, %316 : vector<2x64xf32>
    %364 = arith.mulf %358, %362 : vector<2x64xf32>
    %365 = arith.addf %363, %364 : vector<2x64xf32>
    %366 = math.tanh %365 : vector<2x64xf32>
    %367 = arith.mulf %360, %366 : vector<2x64xf32>
    %c0_140 = arith.constant 0 : index
    %c0_141 = arith.constant 0 : index
    %368 = vector.load %arg2[%c0_140, %c0_141] : memref<64x256xf32, #tpu.memory_space<vmem>>, vector<64x256xf32>
    %cst_142 = arith.constant dense<0.000000e+00> : vector<2x256xf32>
    %369 = tpu.matmul %367, %368, %cst_142 {dimension_numbers = #tpu.dot_dimension_numbers<[1], [0], [0], [1], [0, 0, 1, 1], [], []>} : vector<2x64xf32>, vector<64x256xf32>, vector<2x256xf32> -> vector<2x256xf32>
    %c0_143 = arith.constant 0 : index
    %c0_144 = arith.constant 0 : index
    %370 = vector.load %arg3[%c0_143, %c0_144] : memref<64x256xf32, #tpu.memory_space<vmem>>, vector<64x256xf32>
    %cst_145 = arith.constant dense<0.000000e+00> : vector<2x256xf32>
    %371 = tpu.matmul %343, %370, %cst_145 {dimension_numbers = #tpu.dot_dimension_numbers<[1], [0], [0], [1], [0, 0, 1, 1], [], []>} : vector<2x64xf32>, vector<64x256xf32>, vector<2x256xf32> -> vector<2x256xf32>
    %372 = arith.addf %369, %371 : vector<2x256xf32>
    %c0_146 = arith.constant 0 : index
    %c0_147 = arith.constant 0 : index
    %373 = vector.load %arg4[%c0_146, %c0_147] : memref<2x256xf32, #tpu.memory_space<vmem>>, vector<2x256xf32>
    %374 = arith.addf %372, %373 : vector<2x256xf32>
    %375 = vector.extract_strided_slice %374 {offsets = [0, 0], sizes = [2, 192], strides = [1, 1]} : vector<2x256xf32> to vector<2x192xf32>
    %cst_148 = arith.constant 5.000000e-01 : f32
    %376 = vector.broadcast %cst_148 : f32 to vector<2x192xf32>
    %377 = arith.mulf %376, %375 : vector<2x192xf32>
    %378 = math.tanh %377 : vector<2x192xf32>
    %cst_149 = arith.constant 5.000000e-01 : f32
    %379 = vector.broadcast %cst_149 : f32 to vector<2x192xf32>
    %380 = arith.mulf %379, %378 : vector<2x192xf32>
    %cst_150 = arith.constant 5.000000e-01 : f32
    %381 = vector.broadcast %cst_150 : f32 to vector<2x192xf32>
    %382 = arith.addf %380, %381 : vector<2x192xf32>
    %383 = vector.extract_strided_slice %382 {offsets = [0, 0], sizes = [2, 64], strides = [1, 1]} : vector<2x192xf32> to vector<2x64xf32>
    %384 = vector.extract_strided_slice %382 {offsets = [0, 64], sizes = [2, 64], strides = [1, 1]} : vector<2x192xf32> to vector<2x64xf32>
    %385 = vector.extract_strided_slice %382 {offsets = [0, 128], sizes = [2, 64], strides = [1, 1]} : vector<2x192xf32> to vector<2x64xf32>
    %386 = vector.extract_strided_slice %374 {offsets = [0, 192], sizes = [2, 64], strides = [1, 1]} : vector<2x256xf32> to vector<2x64xf32>
    %387 = math.tanh %386 : vector<2x64xf32>
    %388 = arith.mulf %384, %341 : vector<2x64xf32>
    %389 = arith.mulf %383, %387 : vector<2x64xf32>
    %390 = arith.addf %388, %389 : vector<2x64xf32>
    %391 = math.tanh %390 : vector<2x64xf32>
    %392 = arith.mulf %385, %391 : vector<2x64xf32>
    %c8_i32 = arith.constant 8 : i32
    %c0_151 = arith.constant 0 : index
    %c0_152 = arith.constant 0 : index
    %393 = vector.load %arg5[%c0_151, %c0_152] : memref<1x64xf32, #tpu.memory_space<vmem>>, vector<1x64xf32>
    %394 = vector.broadcast %393 : vector<1x64xf32> to vector<2x64xf32>
    %395 = arith.mulf %392, %394 : vector<2x64xf32>
    %cst_153 = arith.constant dense<0.000000e+00> : vector<2xf32>
    %396 = vector.multi_reduction <add>, %395, %cst_153 [1] : vector<2x64xf32> to vector<2xf32>
    %397 = vector.shape_cast %396 : vector<2xf32> to vector<2x1xf32>
    %c0_154 = arith.constant 0 : index
    %c0_155 = arith.constant 0 : index
    %398 = vector.load %arg6[%c0_154, %c0_155] : memref<1x1xf32, #tpu.memory_space<vmem>>, vector<1x1xf32>
    %399 = vector.broadcast %398 : vector<1x1xf32> to vector<2x1xf32>
    %400 = arith.addf %397, %399 : vector<2x1xf32>
    %c0_156 = arith.constant 0 : index
    %c0_157 = arith.constant 0 : index
    %401 = vector.load %arg7[%c0_156, %c0_157] : memref<2x1xf32, #tpu.memory_space<vmem>>, vector<2x1xf32>
    tpu.vector_store %arg7[%c0_156, %c0_157], %400 {strides = array<i32>} : memref<2x1xf32, #tpu.memory_space<vmem>>, vector<2x1xf32>,
    return
  }
}

</mosaic_0001>

<bundles_post_ra>
// kernel: tpu_custom_call.1
= control target key start
LH: loop header
LB: loop body
LE: loop exit
PB: predicated region body
PF: predicated region fallthrough
CT: control target
= control target key end

     0   :  { %s3664_s0 = inlined_call_operand.hbm [shape: f32[8,2,256], index: 0, kind: input, shape index: {}]   ;;  %s3665_s1 = inlined_call_operand.hbm [shape: f32[64,256], index: 1, kind: input, shape index: {}]   ;;  %s3666_s2 = inlined_call_operand.hbm [shape: f32[64,256], index: 2, kind: input, shape index: {}]   ;;  %s3667_s3 = inlined_call_operand.hbm [shape: f32[64,256], index: 3, kind: input, shape index: {}]   ;;  %s3668_s4 = inlined_call_operand.vmem [shape: f32[2,256], index: 4, kind: input, shape index: {}]   ;;  %s3669_s5 = inlined_call_operand.vmem [shape: f32[1,64], index: 5, kind: input, shape index: {}]   ;;  %s3670_s6 = inlined_call_operand.<no memory space> [shape: f32[1,1], index: 6, kind: input, shape index: {}]   ;;  %s3671_s7 = inlined_call_operand.vmem [shape: f32[2,1], index: 7, kind: output, shape index: {}]  }
   0x1   :  { %v12_v0 = vstv %s3670_s6 }
   0x2   :  { %13 = vst [vmem:[#allocation2] sm:$0x1] %v12_v0 }
   0x3   :  { %14 = vsyncpa [#allocation4], 0 }
   0x4   :  { %15 = vsyncpa [#allocation6], 0 }
   0x5   :  { %16 = vsyncpa [#allocation9], 0  ;;  %s3110_s26 = smov [#allocation5]   ;;  %s3016_s30 = scalar_lea.hbm %s3665_s1, 2048 }
   0x6   :  { %s34_s27 = sshll.u32 %s3110_s26, 4  ;;  %p3017_p0 = scmp.ne.s32.totalorder %s3665_s1, %s3016_s30  ;;  %s35_s27 = int_to_ptr.vmem [resolvable:$true] %s34_s27 }
   0x7   :  { %p3020_p1 = scmp.lt.u32.totalorder %s3016_s30, %s3665_s1 }
   0x9   :  { %p3022_p2 = pnand %p3020_p1, %p3017_p0 }
   0xb   :  { %3025 = shalt.err (!%p3022_p2)
}
   0xc   :  { %s3026_s6 = scalar_lea.vmem %s35_s27, 2048  ;;  %p3031_p4 = scmp.lt.s32.totalorder %s35_s27, %s35_s27 }
   0xd   :  { %p3027_p3 = scmp.ne.s32.totalorder %s35_s27, %s3026_s6  ;;  %p3032_p5 = scmp.lt.s32.totalorder %s3026_s6, %s3026_s6 }
   0xf   :  { %p3033_p6 = por %p3032_p5, %p3031_p4 }
  0x11   :  { %p3034_p7 = pnand %p3033_p6, %p3027_p3 }
  0x13   :  { %3037 = shalt.err (!%p3034_p7)
}
  0x14   :  { %s3111_s12 = smov 256   ;;  %s3112_s13 = smov 16  }
  0x15   :  { %40 = dma.hbm_to_vmem [thread:$0]  %s3665_s1, 2048, %s35_s27, [#allocation6], %s3111_s12, %s3111_s12, %s3112_s13  }
  0x16   :  { %s3113_s16 = smov [#allocation3]   ;;  %s3038_s20 = scalar_lea.hbm %s3664_s0, 512 }
  0x17   :  { %s22_s17 = sshll.u32 %s3113_s16, 4  ;;  %p3039_p8 = scmp.ne.s32.totalorder %s3664_s0, %s3038_s20  ;;  %s23_s17 = int_to_ptr.vmem [resolvable:$true] %s22_s17 }
  0x18   :  { %p3042_p9 = scmp.lt.u32.totalorder %s3038_s20, %s3664_s0 }
  0x1a   :  { %p3044_p10 = pnand %p3042_p9, %p3039_p8 }
  0x1c   :  { %3047 = shalt.err (!%p3044_p10)
}
  0x1d   :  { %s3048_s25 = scalar_lea.vmem %s23_s17, 512  ;;  %p3053_p12 = scmp.lt.s32.totalorder %s23_s17, %s23_s17 }
  0x1e   :  { %p3049_p11 = scmp.ne.s32.totalorder %s23_s17, %s3048_s25  ;;  %p3054_p13 = scmp.lt.s32.totalorder %s3048_s25, %s3048_s25 }
  0x20   :  { %p3055_p0 = por %p3054_p13, %p3053_p12 }
  0x22   :  { %p3056_p1 = pnand %p3055_p0, %p3049_p11 }
  0x24   :  { %3059 = shalt.err (!%p3056_p1)
}
  0x25   :  { %s3114_s1 = smov 64   ;;  %s3115_s26 = smov 4  }
  0x26   :  { %28 = dma.hbm_to_vmem [thread:$0]  %s3664_s0, 512, %s23_s17, [#allocation4], %s3114_s1, %s3114_s1, %s3115_s26  }
  0x27   :  { %s3116_s29 = smov [#allocation7]   ;;  %s3117_s8 = smov [#allocation8]  }
  0x28   :  { %s46_s30 = sshll.u32 %s3116_s29, 4  ;;  %s58_s9 = sshll.u32 %s3117_s8, 4  ;;  %s47_s30 = int_to_ptr.vmem [resolvable:$true] %s46_s30  ;;  %s3192_s9 = int_to_ptr.vmem [resolvable:$true] %s58_s9 }
  0x29   :  { %s3060_s6 = scalar_lea.hbm %s3666_s2, 2048 }
  0x2a   :  { %p3061_p2 = scmp.ne.s32.totalorder %s3666_s2, %s3060_s6  ;;  %p3064_p3 = scmp.lt.u32.totalorder %s3060_s6, %s3666_s2 }
  0x2c   :  { %p3066_p4 = pnand %p3064_p3, %p3061_p2 }
  0x2e   :  { %3069 = shalt.err (!%p3066_p4)
}
  0x2f   :  { %s3070_s0 = scalar_lea.vmem %s47_s30, 2048  ;;  %p3075_p6 = scmp.lt.s32.totalorder %s47_s30, %s47_s30 }
  0x30   :  { %p3071_p5 = scmp.ne.s32.totalorder %s47_s30, %s3070_s0  ;;  %p3076_p7 = scmp.lt.s32.totalorder %s3070_s0, %s3070_s0 }
  0x32   :  { %p3077_p8 = por %p3076_p7, %p3075_p6 }
  0x34   :  { %p3078_p9 = pnand %p3077_p8, %p3071_p5 }
  0x36   :  { %3081 = shalt.err (!%p3078_p9)
}
  0x37   :  { %52 = dma.hbm_to_vmem [thread:$0]  %s3666_s2, 2048, %s47_s30, [#allocation6], %s3111_s12, %s3111_s12, %s3112_s13  }
  0x38   :  { %s3082_s22 = scalar_lea.hbm %s3667_s3, 2048 }
  0x39   :  { %p3083_p10 = scmp.ne.s32.totalorder %s3667_s3, %s3082_s22  ;;  %p3086_p11 = scmp.lt.u32.totalorder %s3082_s22, %s3667_s3 }
  0x3b   :  { %p3088_p12 = pnand %p3086_p11, %p3083_p10 }
  0x3d   :  { %3091 = shalt.err (!%p3088_p12)
}
  0x3e   :  { %s3092_s27 = scalar_lea.vmem %s3192_s9, 2048  ;;  %p3097_p0 = scmp.lt.s32.totalorder %s3192_s9, %s3192_s9 }
  0x3f   :  { %p3093_p13 = scmp.ne.s32.totalorder %s3192_s9, %s3092_s27  ;;  %p3098_p1 = scmp.lt.s32.totalorder %s3092_s27, %s3092_s27 }
  0x41   :  { %p3099_p2 = por %p3098_p1, %p3097_p0 }
  0x43   :  { %p3100_p3 = pnand %p3099_p2, %p3093_p13 }
  0x45   :  { %3103 = shalt.err (!%p3100_p3)
}
  0x46   :  { %64 = dma.hbm_to_vmem [thread:$0]  %s3667_s3, 2048, %s3192_s9, [#allocation9], %s3111_s12, %s3111_s12, %s3112_s13  }
  0x47   :  { %3104 = dma.done.wait [#allocation4], 512  }
  0x48   :  { %3105 = vsyncadd [#allocation4], 4294966784 }
  0x49   :  { %3106 = dma.done.wait [#allocation6], 4096  }
  0x4a   :  { %3107 = vsyncadd [#allocation6], 4294963200 }
  0x4b   :  { %3108 = dma.done.wait [#allocation9], 2048  }
  0x4c   :  { %3109 = vsyncadd [#allocation9], 4294965248  ;;  %v3118_v1 = vmov 0.0   ;;  %v85_v2 = vld [vmem:[#allocation5 + $0x8] sm:$0xff]  ;;  %v87_v3 = vld [vmem:[#allocation5 + $0x18] sm:$0xff]  ;;  %v181_v28 = vlaneseq  ;;  %vm100_vm0 = vcmask 523264  }
  0x4d   :  { %168 = vmatprep.mubr.f32.mxu1 %v3118_v1  ;;  %496 = vmatprep.mubr.f32.mxu0 %v3118_v1  ;;  %v84_v4 = vld [vmem:[#allocation5] sm:$0xff]  ;;  %v3231_v5 = vpack.c.bf16 %v87_v3, %v85_v2  ;;  %v86_v6 = vld [vmem:[#allocation5 + $0x10] sm:$0xff]  ;;  %v89_v7 = vld [vmem:[#allocation5 + $0x28] sm:$0xff]  ;;  %v3119_v26 = vmov 1983009808   ;;  %vm2447_vm1 = vcmask 517120  }
  0x4e   :  { %v91_v8 = vld [vmem:[#allocation5 + $0x38] sm:$0xff]  ;;  %v3233_v9 = vpack.c.bf16 %v86_v6, %v84_v4  ;;  %v88_v11 = vld [vmem:[#allocation5 + $0x20] sm:$0xff]  ;;  %v90_v12 = vld [vmem:[#allocation5 + $0x30] sm:$0xff]  ;;  %v179_v27 = vunpack.c.l.s4 %v3119_v26  ;;  %v182_v30 = vshrl.u32 %v181_v28, 7  ;;  %vm2459_vm2 = vcmask 1024  }
  0x4f   :  { %v3235_v10 = vpack.c.bf16 %v91_v8, %v89_v7  ;;  %v93_v13 = vld [vmem:[#allocation5 + $0x48] sm:$0xff]  ;;  %2494 = vmatprep.subr.bf16.mxu1 %v3231_v5  ;;  %v95_v14 = vld [vmem:[#allocation5 + $0x58] sm:$0xff]  ;;  %2542 = vmatprep.subr.bf16.mxu0 %v3231_v5  ;;  %v3240_v15 = vpack.c.bf16 %v90_v12, %v88_v11  ;;  %v92_v17 = vld [vmem:[#allocation5 + $0x40] sm:$0xff] }
  0x50   :  { %2496 = vmatpush1.bf16.msra.mxu1 %v3233_v9  ;;  %2544 = vmatpush1.bf16.msra.mxu0 %v3233_v9  ;;  %v3244_v16 = vpack.c.bf16 %v95_v14, %v93_v13  ;;  %v94_v18 = vld [vmem:[#allocation5 + $0x50] sm:$0xff]  ;;  %v97_v19 = vld [vmem:[#allocation5 + $0x68] sm:$0xff]  ;;  %v99_v20 = vld [vmem:[#allocation5 + $0x78] sm:$0xff]  ;;  %v180_v29 = vunpack.c.0.s8 %v179_v27 }
  0x51   :  { %2498 = vmatprep.subr.bf16.mxu1 %v3235_v10  ;;  %2546 = vmatprep.subr.bf16.mxu0 %v3235_v10  ;;  %v3248_v21 = vpack.c.bf16 %v94_v18, %v92_v17  ;;  %v3252_v22 = vpack.c.bf16 %v99_v20, %v97_v19  ;;  %v96_v23 = vld [vmem:[#allocation5 + $0x60] sm:$0xff]  ;;  %v98_v24 = vld [vmem:[#allocation5 + $0x70] sm:$0xff]  ;;  %v230_v46 = vld [vmem:[#allocation8 + $0x8] sm:$0xff] }
  0x52   :  { %v3256_v25 = vpack.c.bf16 %v98_v24, %v96_v23  ;;  %v3265_v32 = vsub.s32 %v180_v29, %v182_v30  ;;  %v83_v35 = vld [vmem:[#allocation3] sm:$0xf]  ;;  %v232_v47 = vld [vmem:[#allocation8 + $0x18] sm:$0xff]  ;;  %v231_v50 = vld [vmem:[#allocation8 + $0x10] sm:$0xff] }
  0x53   :  { %v229_v48 = vld [vmem:[#allocation8] sm:$0xff]  ;;  %v3273_v49 = vpack.c.bf16 %v232_v47, %v230_v46  ;;  %v234_v51 = vld [vmem:[#allocation8 + $0x28] sm:$0xff]  ;;  %v236_v52 = vld [vmem:[#allocation8 + $0x38] sm:$0xff] }
  0x54   :  { %2500 = vmatpush1.bf16.msra.mxu1 %v3240_v15  ;;  %2548 = vmatpush1.bf16.msra.mxu0 %v3240_v15  ;;  %v3275_v53 = vpack.c.bf16 %v231_v50, %v229_v48  ;;  %v3277_v54 = vpack.c.bf16 %v236_v52, %v234_v51  ;;  %v233_v55 = vld [vmem:[#allocation8 + $0x20] sm:$0xff]  ;;  %v235_v56 = vld [vmem:[#allocation8 + $0x30] sm:$0xff]  ;;  %v238_v57 = vld [vmem:[#allocation8 + $0x48] sm:$0xff] }
  0x55   :  { %2502 = vmatprep.subr.bf16.mxu1 %v3244_v16  ;;  %2550 = vmatprep.subr.bf16.mxu0 %v3244_v16  ;;  %v240_v58 = vld [vmem:[#allocation8 + $0x58] sm:$0xff]  ;;  %v3282_v59 = vpack.c.bf16 %v235_v56, %v233_v55  ;;  %v237_v61 = vld [vmem:[#allocation8 + $0x40] sm:$0xff]  ;;  %v239_v62 = vld [vmem:[#allocation8 + $0x50] sm:$0xff] }
  0x56   :  { %v3285_v60 = vpack.c.bf16 %v240_v58, %v238_v57  ;;  %v242_v63 = vld [vmem:[#allocation8 + $0x68] sm:$0xff]  ;;  %v244_v0 = vld [vmem:[#allocation8 + $0x78] sm:$0xff]  ;;  %v3288_v2 = vpack.c.bf16 %v239_v62, %v237_v61  ;;  %v241_v4 = vld [vmem:[#allocation8 + $0x60] sm:$0xff] }
  0x57   :  { %v3291_v3 = vpack.c.bf16 %v244_v0, %v242_v63  ;;  %v243_v6 = vld [vmem:[#allocation8 + $0x70] sm:$0xff]  ;;  %v214_v7 = vld [vmem:[#allocation7 + $0x8] sm:$0xff]  ;;  %v216_v8 = vld [vmem:[#allocation7 + $0x18] sm:$0xff] }
  0x58   :  { %2504 = vmatpush1.bf16.msra.mxu1 %v3248_v21  ;;  %2552 = vmatpush1.bf16.msra.mxu0 %v3248_v21  ;;  %v3294_v11 = vpack.c.bf16 %v243_v6, %v241_v4  ;;  %v3297_v12 = vpack.c.bf16 %v216_v8, %v214_v7  ;;  %v213_v13 = vld [vmem:[#allocation7] sm:$0xff]  ;;  %v215_v14 = vld [vmem:[#allocation7 + $0x10] sm:$0xff]  ;;  %v218_v17 = vld [vmem:[#allocation7 + $0x28] sm:$0xff] }
  0x59   :  { %2506 = vmatprep.subr.bf16.mxu1 %v3252_v22  ;;  %2554 = vmatprep.subr.bf16.mxu0 %v3252_v22  ;;  %v220_v18 = vld [vmem:[#allocation7 + $0x38] sm:$0xff]  ;;  %v3300_v19 = vpack.c.bf16 %v215_v14, %v213_v13  ;;  %v217_v23 = vld [vmem:[#allocation7 + $0x20] sm:$0xff]  ;;  %v219_v24 = vld [vmem:[#allocation7 + $0x30] sm:$0xff] }
  0x5a   :  { %v3303_v20 = vpack.c.bf16 %v220_v18, %v218_v17  ;;  %v222_v26 = vld [vmem:[#allocation7 + $0x48] sm:$0xff]  ;;  %v224_v27 = vld [vmem:[#allocation7 + $0x58] sm:$0xff]  ;;  %v3307_v28 = vpack.c.bf16 %v219_v24, %v217_v23  ;;  %v221_v30 = vld [vmem:[#allocation7 + $0x40] sm:$0xff] }
  0x5b   :  { %v3311_v29 = vpack.c.bf16 %v224_v27, %v222_v26  ;;  %v431_v58 = vld [vmem:[#allocation3 + $0x4] sm:$0xf] }
  0x5c   :  { %2508 = vmatpush1.bf16.msra.mxu1 %v3256_v25  ;;  %2556 = vmatpush1.bf16.msra.mxu0 %v3256_v25 }
  0x5d   :  { %2510 = vmatprep.subr.bf16.mxu1 %v3273_v49  ;;  %2558 = vmatprep.subr.bf16.mxu0 %v3273_v49 }
  0x5f   :  { %169 = vmatmul.mubr.f32.vlgmr.msra.gmra.mrb[0].mxu1 %v3118_v1 }
  0x60   :  { %309 = vmatprep.mubr.f32.mxu1 %v3118_v1  ;;  %2512 = vmatpush1.bf16.msra.mxu1 %v3275_v53 }
  0x61   :  { %2514 = vmatprep.subr.bf16.mxu1 %v3277_v54 }
  0x64   :  { %2516 = vmatpush1.bf16.msra.mxu1 %v3282_v59 }
  0x65   :  { %2518 = vmatprep.subr.bf16.mxu1 %v3285_v60 }
  0x68   :  { %2520 = vmatpush1.bf16.msra.mxu1 %v3288_v2 }
  0x69   :  { %2522 = vmatprep.subr.bf16.mxu1 %v3291_v3 }
  0x6c   :  { %2524 = vmatpush1.bf16.msra.mxu1 %v3294_v11 }
  0x6d   :  { %2526 = vmatprep.subr.bf16.mxu1 %v3297_v12 }
  0x6f   :  { %310 = vmatmul.mubr.f32.vlgmr.msra.gmra.mrb[2].mxu1 %v3118_v1 }
  0x70   :  { %2528 = vmatpush1.bf16.msra.mxu1 %v3300_v19  ;;  %383 = vmatprep.mubr.f32.mxu1 %v3118_v1 }
  0x71   :  { %2530 = vmatprep.subr.bf16.mxu1 %v3303_v20 }
  0x74   :  { %2532 = vmatpush1.bf16.msra.mxu1 %v3307_v28 }
  0x75   :  { %2534 = vmatprep.subr.bf16.mxu1 %v3311_v29 }
 0x132   :  { %v170_v31 = vpop.f32.mrb[0].mxu1 }
 0x133   :  { %v172_v33 = vpop.f32.mrb[1].mxu1 }
 0x134   :  { %v177_v34 = vcombine.low %v170_v31, %v172_v33  ;;  %v223_v31 = vld [vmem:[#allocation7 + $0x50] sm:$0xff]  ;;  %v226_v33 = vld [vmem:[#allocation7 + $0x68] sm:$0xff] }
 0x136   :  { %v184_v36 = vrot.slane %v177_v34, %v3265_v32  ;;  %v228_v34 = vld [vmem:[#allocation7 + $0x78] sm:$0xff] }
 0x138   :  { %v186_v37 = vadd.f32 %v184_v36, %v83_v35  ;;  %v3314_v35 = vpack.c.bf16 %v223_v31, %v221_v30  ;;  %v3317_v36 = vpack.c.bf16 %v228_v34, %v226_v33 }
 0x13a   :  { %192 = vrot.lane.b32.xlu0 %v186_v37, %s3114_s1  ;;  %v187_v38 = vmul.f32 0.5, %v186_v37  ;;  %v225_v37 = vld [vmem:[#allocation7 + $0x60] sm:$0xff]  ;;  %2536 = vmatpush1.bf16.msra.mxu1 %v3314_v35 }
 0x13b   :  { %2538 = vmatprep.subr.bf16.mxu1 %v3317_v36 }
 0x13c   :  { %2903 = vtanh.f32 %v187_v38  ;;  %v227_v38 = vld [vmem:[#allocation7 + $0x70] sm:$0xff] }
 0x146   :  { %v2904_v41 = vpop.eup %2903 }
 0x147   :  { %v189_v42 = vmul.f32 0.5, %v2904_v41 }
 0x149   :  { %v3269_v43 = vadd.f32 0.5, %v189_v42 }
 0x1ac   :  { %v193_v39 = vpop.permute.xlu0 %192 }
 0x1ad   :  { %v194_v40 = vrot.slane %v193_v39, 2  ;;  %v3320_v39 = vpack.c.bf16 %v227_v38, %v225_v37 }
 0x1af   :  { %2905 = vtanh.f32 %v194_v40  ;;  %2540 = vmatpush1.bf16.msra.mxu1 %v3320_v39  ;;  %v197_v40 = vmul.f32 0.0, %v3269_v43 }
 0x1b0   :  { %2590 = vmatprep.subr.bf16.mxu1 %v3231_v5 }
 0x1b9   :  { %v2906_v44 = vpop.eup %2905 }
 0x1ba   :  { %v198_v45 = vmul.f32 %v2906_v44, %v3269_v43 }
 0x1bc   :  { %200 = vrot.lane.b32.xlu0 %v198_v45, %s3114_s1  ;;  %v206_v45 = vrot.slane %v3269_v43, 2  ;;  %v3354_v43 = vld.sshfl [vmem:[%s3668_s4] sm:$0x33 pattern:$0x76325410] }
 0x1bd   :  { %v3358_v48 = vcombine.high %v3354_v43, %v3354_v43 }
 0x22e   :  { %v201_v41 = vpop.permute.xlu0 %200 }
 0x22f   :  { %v3326_v42 = vadd.f32 %v201_v41, %v197_v40 }
 0x231   :  { %2907 = vtanh.f32 %v3326_v42 }
 0x23b   :  { %v2908_v44 = vpop.eup %2907 }
 0x23c   :  { %209 = vrot.lane.b32.xlu1 %v2908_v44, %s3114_s1 }
 0x2ae   :  { %v210_v46 = vpop.permute.xlu1 %209 }
 0x2af   :  { %v212_v47 = vmul.f32 %v210_v46, %v206_v45 }
 0x2b1   :  { %2468 = vmatmul.mubr.msk.f32.vlgmr.msra.gmra.mrb[2].mxu1 %vm100_vm0, %v212_v47  ;;  %2470 = vmatmul.mubr.msk.f32.vlgmr.msra.gmra.mrb[0].mxu0 %vm100_vm0, %v212_v47 }
 0x2b2   :  { %2560 = vmatpush1.bf16.msra.mxu0 %v3275_v53  ;;  %2592 = vmatpush1.bf16.msra.mxu1 %v3233_v9 }
 0x2b3   :  { %2562 = vmatprep.subr.bf16.mxu0 %v3277_v54  ;;  %2594 = vmatprep.subr.bf16.mxu1 %v3235_v10 }
 0x2b4   :  { %608 = vmatprep.mubr.f32.mxu0 %v3118_v1  ;;  %783 = vmatprep.mubr.f32.mxu1 %v3118_v1 }
 0x2b6   :  { %2564 = vmatpush1.bf16.msra.mxu0 %v3282_v59  ;;  %2596 = vmatpush1.bf16.msra.mxu1 %v3240_v15 }
 0x2b7   :  { %2566 = vmatprep.subr.bf16.mxu0 %v3285_v60  ;;  %2598 = vmatprep.subr.bf16.mxu1 %v3244_v16 }
 0x2ba   :  { %2568 = vmatpush1.bf16.msra.mxu0 %v3288_v2  ;;  %2600 = vmatpush1.bf16.msra.mxu1 %v3248_v21 }
 0x2bb   :  { %2570 = vmatprep.subr.bf16.mxu0 %v3291_v3  ;;  %2602 = vmatprep.subr.bf16.mxu1 %v3252_v22 }
 0x2be   :  { %2572 = vmatpush1.bf16.msra.mxu0 %v3294_v11  ;;  %2604 = vmatpush1.bf16.msra.mxu1 %v3256_v25 }
 0x2bf   :  { %2574 = vmatprep.subr.bf16.mxu0 %v3297_v12  ;;  %2606 = vmatprep.subr.bf16.mxu1 %v3273_v49 }
 0x384   :  { %v385_v50 = vpop.f32.mrb[2].mxu1  ;;  %v498_v51 = vpop.f32.mrb[0].mxu0 }
 0x385   :  { %v387_v52 = vpop.f32.mrb[3].mxu1  ;;  %v500_v55 = vpop.f32.mrb[1].mxu0  ;;  %v402_v0 = vadd.f32 %v3354_v43, %v385_v50 }
 0x386   :  { %v403_v56 = vadd.f32 %v3358_v48, %v387_v52  ;;  %v505_v57 = vcombine.low %v498_v51, %v500_v55 }
 0x387   :  { %v404_v4 = vmul.f32 0.5, %v402_v0 }
 0x388   :  { %2909 = vtanh.f32 %v403_v56  ;;  %v512_v61 = vrot.slane %v505_v57, %v3265_v32  ;;  %v405_v46 = vmul.f32 0.5, %v403_v56 }
 0x389   :  { %2911 = vtanh.f32 %v404_v4 }
 0x38a   :  { %v514_v62 = vadd.f32 %v512_v61, %v431_v58 }
 0x38c   :  { %520 = vrot.lane.b32.xlu0 %v514_v62, %s3114_s1  ;;  %v515_v6 = vmul.f32 0.5, %v514_v62 }
 0x38e   :  { %2913 = vtanh.f32 %v515_v6 }
 0x392   :  { %v2910_v63 = vpop.eup %2909 }
 0x393   :  { %415 = vrot.lane.b32.xlu1 %v2910_v63, %s3114_s1  ;;  %v2912_v7 = vpop.eup %2911  ;;  %v718_v63 = vld [vmem:[#allocation3 + $0x8] sm:$0xf] }
 0x394   :  { %v408_v14 = vmul.f32 0.5, %v2912_v7 }
 0x396   :  { %v410_v18 = vadd.f32 0.5, %v408_v14 }
 0x398   :  { %v2914_v17 = vpop.eup %2913  ;;  %v413_v33 = vmul.f32 0.0, %v410_v18 }
 0x399   :  { %v517_v26 = vmul.f32 0.5, %v2914_v17 }
 0x39b   :  { %v518_v27 = vadd.f32 0.5, %v517_v26 }
 0x39d   :  { %v525_v38 = vmul.f32 %v518_v27, %v3326_v42  ;;  %v534_v42 = vrot.slane %v518_v27, 2 }
 0x3fe   :  { %v521_v8 = vpop.permute.xlu0 %520 }
 0x3ff   :  { %v522_v13 = vrot.slane %v521_v8, 2 }
 0x401   :  { %2915 = vtanh.f32 %v522_v13 }
 0x405   :  { %v416_v23 = vpop.permute.xlu1 %415 }
 0x406   :  { %v418_v24 = vmul.f32 %v416_v23, %v410_v18 }
 0x408   :  { %420 = vrot.lane.b32.xlu1 %v418_v24, %s3114_s1 }
 0x40b   :  { %v2916_v30 = vpop.eup %2915 }
 0x40c   :  { %v526_v31 = vmul.f32 %v2916_v30, %v518_v27 }
 0x40e   :  { %528 = vrot.lane.b32.xlu0 %v526_v31, %s3114_s1 }
 0x47a   :  { %v421_v34 = vpop.permute.xlu1 %420 }
 0x47b   :  { %v3367_v37 = vadd.f32 %v421_v34, %v413_v33 }
 0x47d   :  { %2917 = vtanh.f32 %v3367_v37 }
 0x480   :  { %v529_v40 = vpop.permute.xlu0 %528 }
 0x481   :  { %v3371_v41 = vadd.f32 %v529_v40, %v525_v38 }
 0x483   :  { %2919 = vtanh.f32 %v3371_v41 }
 0x484   :  { %2921 = vtanh.f32 %v405_v46 }
 0x487   :  { %v2918_v44 = vpop.eup %2917 }
 0x488   :  { %426 = vrot.lane.b32.xlu1 %v2918_v44, %s3114_s1 }
 0x48d   :  { %v2920_v45 = vpop.eup %2919 }
 0x48e   :  { %537 = vrot.lane.b32.xlu0 %v2920_v45, %s3114_s1  ;;  %v2922_v47 = vpop.eup %2921 }
 0x48f   :  { %v409_v50 = vmul.f32 0.5, %v2922_v47 }
 0x491   :  { %v411_v51 = vadd.f32 0.5, %v409_v50 }
 0x4fa   :  { %v427_v52 = vpop.permute.xlu1 %426 }
 0x4fb   :  { %v429_v55 = vmul.f32 %v427_v52, %v411_v51 }
 0x4fd   :  { %2471 = vmatmul.mubr.msk.f32.vlgmr.msra.gmra.mrb[2].mxu0 %vm100_vm0, %v429_v55 }
 0x4fe   :  { %2576 = vmatpush1.bf16.msra.mxu0 %v3300_v19  ;;  %682 = vmatprep.mubr.f32.mxu0 %v3118_v1 }
 0x4ff   :  { %2578 = vmatprep.subr.bf16.mxu0 %v3303_v20 }
 0x500   :  { %v538_v57 = vpop.permute.xlu0 %537 }
 0x501   :  { %v540_v58 = vmul.f32 %v538_v57, %v534_v42 }
 0x502   :  { %2580 = vmatpush1.bf16.msra.mxu0 %v3307_v28 }
 0x503   :  { %2473 = vmatmul.mubr.msk.f32.vlgmr.msra.gmra.mrb[4].mxu1 %vm100_vm0, %v540_v58  ;;  %2582 = vmatprep.subr.bf16.mxu0 %v3311_v29 }
 0x504   :  { %2608 = vmatpush1.bf16.msra.mxu1 %v3275_v53  ;;  %895 = vmatprep.mubr.f32.mxu1 %v3118_v1 }
 0x505   :  { %2610 = vmatprep.subr.bf16.mxu1 %v3277_v54 }
 0x506   :  { %2584 = vmatpush1.bf16.msra.mxu0 %v3314_v35 }
 0x507   :  { %2586 = vmatprep.subr.bf16.mxu0 %v3317_v36 }
 0x508   :  { %2612 = vmatpush1.bf16.msra.mxu1 %v3282_v59 }
 0x509   :  { %2614 = vmatprep.subr.bf16.mxu1 %v3285_v60 }
 0x50a   :  { %2588 = vmatpush1.bf16.msra.mxu0 %v3320_v39 }
 0x50b   :  { %2638 = vmatprep.subr.bf16.mxu0 %v3231_v5 }
 0x50c   :  { %2616 = vmatpush1.bf16.msra.mxu1 %v3288_v2 }
 0x50d   :  { %2472 = vmatmul.mubr.msk.f32.vlgmr.msra.gmra.mrb[2].mxu0 %vm100_vm0, %v540_v58  ;;  %2618 = vmatprep.subr.bf16.mxu1 %v3291_v3 }
 0x50e   :  { %2640 = vmatpush1.bf16.msra.mxu0 %v3233_v9  ;;  %1070 = vmatprep.mubr.f32.mxu0 %v3118_v1 }
 0x50f   :  { %2642 = vmatprep.subr.bf16.mxu0 %v3235_v10 }
 0x510   :  { %2620 = vmatpush1.bf16.msra.mxu1 %v3294_v11 }
 0x511   :  { %2622 = vmatprep.subr.bf16.mxu1 %v3297_v12 }
 0x512   :  { %2644 = vmatpush1.bf16.msra.mxu0 %v3240_v15 }
 0x513   :  { %2646 = vmatprep.subr.bf16.mxu0 %v3244_v16 }
 0x516   :  { %2648 = vmatpush1.bf16.msra.mxu0 %v3248_v21 }
 0x517   :  { %2650 = vmatprep.subr.bf16.mxu0 %v3252_v22 }
 0x51a   :  { %2652 = vmatpush1.bf16.msra.mxu0 %v3256_v25 }
 0x51b   :  { %2654 = vmatprep.subr.bf16.mxu0 %v3273_v49 }
 0x5d6   :  { %v785_v56 = vpop.f32.mrb[4].mxu1 }
 0x5d7   :  { %v787_v61 = vpop.f32.mrb[5].mxu1 }
 0x5d8   :  { %v792_v62 = vcombine.low %v785_v56, %v787_v61 }
 0x5da   :  { %v799_v0 = vrot.slane %v792_v62, %v3265_v32 }
 0x5dc   :  { %v801_v4 = vadd.f32 %v799_v0, %v718_v63 }
 0x5de   :  { %807 = vrot.lane.b32.xlu0 %v801_v4, %s3114_s1  ;;  %v802_v14 = vmul.f32 0.5, %v801_v4 }
 0x5e0   :  { %v684_v6 = vpop.f32.mrb[2].mxu0 }
 0x5e1   :  { %v686_v7 = vpop.f32.mrb[3].mxu0  ;;  %v689_v17 = vadd.f32 %v3354_v43, %v684_v6 }
 0x5e2   :  { %v690_v8 = vadd.f32 %v686_v7, %v3358_v48 }
 0x5e3   :  { %v691_v18 = vmul.f32 0.5, %v689_v17 }
 0x5e4   :  { %2923 = vtanh.f32 %v690_v8  ;;  %v692_v58 = vmul.f32 0.5, %v690_v8 }
 0x5e5   :  { %2925 = vtanh.f32 %v802_v14 }
 0x5e6   :  { %2927 = vtanh.f32 %v691_v18 }
 0x5ee   :  { %v2924_v13 = vpop.eup %2923 }
 0x5ef   :  { %702 = vrot.lane.b32.xlu1 %v2924_v13, %s3114_s1  ;;  %v2926_v26 = vpop.eup %2925  ;;  %v1005_v13 = vld [vmem:[#allocation3 + $0xc] sm:$0xf] }
 0x5f0   :  { %v804_v27 = vmul.f32 0.5, %v2926_v26  ;;  %v2928_v30 = vpop.eup %2927 }
 0x5f1   :  { %v695_v33 = vmul.f32 0.5, %v2928_v30 }
 0x5f2   :  { %v805_v31 = vadd.f32 0.5, %v804_v27 }
 0x5f3   :  { %v697_v40 = vadd.f32 0.5, %v695_v33 }
 0x5f4   :  { %v812_v46 = vmul.f32 %v805_v31, %v3371_v41  ;;  %v821_v56 = vrot.slane %v805_v31, 2 }
 0x5f5   :  { %v700_v51 = vmul.f32 %v697_v40, %v3367_v37 }
 0x650   :  { %v808_v23 = vpop.permute.xlu0 %807 }
 0x651   :  { %v809_v24 = vrot.slane %v808_v23, 2 }
 0x653   :  { %2929 = vtanh.f32 %v809_v24 }
 0x65d   :  { %v2930_v34 = vpop.eup %2929 }
 0x65e   :  { %v813_v38 = vmul.f32 %v2930_v34, %v805_v31 }
 0x660   :  { %815 = vrot.lane.b32.xlu0 %v813_v38, %s3114_s1 }
 0x661   :  { %v703_v44 = vpop.permute.xlu1 %702 }
 0x662   :  { %v705_v45 = vmul.f32 %v703_v44, %v697_v40 }
 0x664   :  { %707 = vrot.lane.b32.xlu1 %v705_v45, %s3114_s1 }
 0x6d2   :  { %v816_v47 = vpop.permute.xlu0 %815 }
 0x6d3   :  { %v3414_v50 = vadd.f32 %v816_v47, %v812_v46 }
 0x6d5   :  { %2931 = vtanh.f32 %v3414_v50 }
 0x6d6   :  { %v708_v52 = vpop.permute.xlu1 %707 }
 0x6d7   :  { %v3418_v55 = vadd.f32 %v708_v52, %v700_v51 }
 0x6d9   :  { %2933 = vtanh.f32 %v3418_v55 }
 0x6da   :  { %2935 = vtanh.f32 %v692_v58 }
 0x6df   :  { %v2932_v42 = vpop.eup %2931 }
 0x6e0   :  { %824 = vrot.lane.b32.xlu0 %v2932_v42, %s3114_s1 }
 0x6e3   :  { %v2934_v57 = vpop.eup %2933 }
 0x6e4   :  { %713 = vrot.lane.b32.xlu1 %v2934_v57, %s3114_s1  ;;  %v2936_v41 = vpop.eup %2935 }
 0x6e5   :  { %v696_v61 = vmul.f32 0.5, %v2936_v41 }
 0x6e7   :  { %v698_v37 = vadd.f32 0.5, %v696_v61 }
 0x752   :  { %v825_v62 = vpop.permute.xlu0 %824 }
 0x753   :  { %v827_v63 = vmul.f32 %v825_v62, %v821_v56 }
 0x755   :  { %2476 = vmatmul.mubr.msk.f32.vlgmr.msra.gmra.mrb[4].mxu0 %vm100_vm0, %v827_v63 }
 0x756   :  { %v714_v0 = vpop.permute.xlu1 %713  ;;  %2656 = vmatpush1.bf16.msra.mxu0 %v3275_v53  ;;  %1182 = vmatprep.mubr.f32.mxu0 %v3118_v1 }
 0x757   :  { %v716_v4 = vmul.f32 %v714_v0, %v698_v37  ;;  %2658 = vmatprep.subr.bf16.mxu0 %v3277_v54 }
 0x759   :  { %2474 = vmatmul.mubr.msk.f32.vlgmr.msra.gmra.mrb[6].mxu1 %vm100_vm0, %v716_v4 }
 0x75a   :  { %2624 = vmatpush1.bf16.msra.mxu1 %v3300_v19  ;;  %969 = vmatprep.mubr.f32.mxu1 %v3118_v1 }
 0x75b   :  { %2626 = vmatprep.subr.bf16.mxu1 %v3303_v20  ;;  %2660 = vmatpush1.bf16.msra.mxu0 %v3282_v59 }
 0x75c   :  { %2662 = vmatprep.subr.bf16.mxu0 %v3285_v60 }
 0x75e   :  { %2628 = vmatpush1.bf16.msra.mxu1 %v3307_v28 }
 0x75f   :  { %2630 = vmatprep.subr.bf16.mxu1 %v3311_v29  ;;  %2664 = vmatpush1.bf16.msra.mxu0 %v3288_v2 }
 0x760   :  { %2666 = vmatprep.subr.bf16.mxu0 %v3291_v3 }
 0x762   :  { %2632 = vmatpush1.bf16.msra.mxu1 %v3314_v35 }
 0x763   :  { %2634 = vmatprep.subr.bf16.mxu1 %v3317_v36  ;;  %2668 = vmatpush1.bf16.msra.mxu0 %v3294_v11 }
 0x764   :  { %2670 = vmatprep.subr.bf16.mxu0 %v3297_v12 }
 0x766   :  { %2636 = vmatpush1.bf16.msra.mxu1 %v3320_v39 }
 0x767   :  { %2686 = vmatprep.subr.bf16.mxu1 %v3231_v5 }
 0x769   :  { %2475 = vmatmul.mubr.msk.f32.vlgmr.msra.gmra.mrb[6].mxu1 %vm100_vm0, %v827_v63 }
 0x76a   :  { %2688 = vmatpush1.bf16.msra.mxu1 %v3233_v9  ;;  %1357 = vmatprep.mubr.f32.mxu1 %v3118_v1 }
 0x76b   :  { %2690 = vmatprep.subr.bf16.mxu1 %v3235_v10 }
 0x76e   :  { %2692 = vmatpush1.bf16.msra.mxu1 %v3240_v15 }
 0x76f   :  { %2694 = vmatprep.subr.bf16.mxu1 %v3244_v16 }
 0x772   :  { %2696 = vmatpush1.bf16.msra.mxu1 %v3248_v21 }
 0x773   :  { %2698 = vmatprep.subr.bf16.mxu1 %v3252_v22 }
 0x776   :  { %2700 = vmatpush1.bf16.msra.mxu1 %v3256_v25 }
 0x777   :  { %2702 = vmatprep.subr.bf16.mxu1 %v3273_v49 }
 0x828   :  { %v1072_v6 = vpop.f32.mrb[4].mxu0 }
 0x829   :  { %v1074_v7 = vpop.f32.mrb[5].mxu0 }
 0x82a   :  { %v1079_v8 = vcombine.low %v1072_v6, %v1074_v7 }
 0x82c   :  { %v1086_v14 = vrot.slane %v1079_v8, %v3265_v32 }
 0x82e   :  { %v1088_v17 = vadd.f32 %v1086_v14, %v1005_v13 }
 0x830   :  { %1094 = vrot.lane.b32.xlu0 %v1088_v17, %s3114_s1  ;;  %v1089_v27 = vmul.f32 0.5, %v1088_v17 }
 0x83c   :  { %v971_v18 = vpop.f32.mrb[6].mxu1 }
 0x83d   :  { %v973_v23 = vpop.f32.mrb[7].mxu1  ;;  %v976_v31 = vadd.f32 %v3354_v43, %v971_v18 }
 0x83e   :  { %v977_v24 = vadd.f32 %v973_v23, %v3358_v48 }
 0x83f   :  { %v978_v38 = vmul.f32 0.5, %v976_v31 }
 0x840   :  { %2937 = vtanh.f32 %v977_v24  ;;  %v979_v4 = vmul.f32 0.5, %v977_v24 }
 0x841   :  { %2939 = vtanh.f32 %v1089_v27 }
 0x84a   :  { %v2938_v26 = vpop.eup %2937 }
 0x84b   :  { %989 = vrot.lane.b32.xlu1 %v2938_v26, %s3114_s1  ;;  %v2940_v34 = vpop.eup %2939  ;;  %v1292_v26 = vld [vmem:[#allocation3 + $0x10] sm:$0xf] }
 0x84c   :  { %v1091_v40 = vmul.f32 0.5, %v2940_v34 }
 0x84e   :  { %v1092_v44 = vadd.f32 0.5, %v1091_v40 }
 0x850   :  { %v1099_v58 = vmul.f32 %v1092_v44, %v3414_v50  ;;  %v1108_v50 = vrot.slane %v1092_v44, 2 }
 0x8a2   :  { %v1095_v30 = vpop.permute.xlu0 %1094 }
 0x8a3   :  { %v1096_v33 = vrot.slane %v1095_v30, 2 }
 0x8a5   :  { %2941 = vtanh.f32 %v1096_v33 }
 0x8a6   :  { %2943 = vtanh.f32 %v978_v38 }
 0x8af   :  { %v2942_v45 = vpop.eup %2941 }
 0x8b0   :  { %v1100_v46 = vmul.f32 %v2942_v45, %v1092_v44  ;;  %v2944_v47 = vpop.eup %2943 }
 0x8b1   :  { %v982_v51 = vmul.f32 0.5, %v2944_v47 }
 0x8b2   :  { %1102 = vrot.lane.b32.xlu0 %v1100_v46, %s3114_s1 }
 0x8b3   :  { %v984_v52 = vadd.f32 0.5, %v982_v51 }
 0x8b5   :  { %v987_v62 = vmul.f32 %v984_v52, %v3418_v55 }
 0x8bd   :  { %v990_v42 = vpop.permute.xlu1 %989 }
 0x8be   :  { %v992_v57 = vmul.f32 %v990_v42, %v984_v52 }
 0x8c0   :  { %994 = vrot.lane.b32.xlu1 %v992_v57, %s3114_s1 }
 0x924   :  { %v1103_v41 = vpop.permute.xlu0 %1102 }
 0x925   :  { %v3461_v56 = vadd.f32 %v1103_v41, %v1099_v58 }
 0x927   :  { %2945 = vtanh.f32 %v3461_v56 }
 0x931   :  { %v2946_v61 = vpop.eup %2945 }
 0x932   :  { %v995_v63 = vpop.permute.xlu1 %994  ;;  %1111 = vrot.lane.b32.xlu0 %v2946_v61, %s3114_s1 }
 0x933   :  { %v3466_v37 = vadd.f32 %v995_v63, %v987_v62 }
 0x935   :  { %2947 = vtanh.f32 %v3466_v37 }
 0x936   :  { %2949 = vtanh.f32 %v979_v4 }
 0x93f   :  { %v2948_v0 = vpop.eup %2947 }
 0x940   :  { %1000 = vrot.lane.b32.xlu1 %v2948_v0, %s3114_s1  ;;  %v2950_v55 = vpop.eup %2949 }
 0x941   :  { %v983_v8 = vmul.f32 0.5, %v2950_v55 }
 0x943   :  { %v985_v13 = vadd.f32 0.5, %v983_v8 }
 0x9a4   :  { %v1112_v6 = vpop.permute.xlu0 %1111 }
 0x9a5   :  { %v1114_v7 = vmul.f32 %v1112_v6, %v1108_v50 }
 0x9a7   :  { %2479 = vmatmul.mubr.msk.f32.vlgmr.msra.gmra.mrb[8].mxu1 %vm100_vm0, %v1114_v7 }
 0x9a8   :  { %2704 = vmatpush1.bf16.msra.mxu1 %v3275_v53  ;;  %1469 = vmatprep.mubr.f32.mxu1 %v3118_v1 }
 0x9a9   :  { %2706 = vmatprep.subr.bf16.mxu1 %v3277_v54 }
 0x9ac   :  { %2708 = vmatpush1.bf16.msra.mxu1 %v3282_v59 }
 0x9ad   :  { %2710 = vmatprep.subr.bf16.mxu1 %v3285_v60 }
 0x9b0   :  { %2712 = vmatpush1.bf16.msra.mxu1 %v3288_v2 }
 0x9b1   :  { %2714 = vmatprep.subr.bf16.mxu1 %v3291_v3 }
 0x9b2   :  { %v1001_v14 = vpop.permute.xlu1 %1000 }
 0x9b3   :  { %v1003_v17 = vmul.f32 %v1001_v14, %v985_v13 }
 0x9b4   :  { %2716 = vmatpush1.bf16.msra.mxu1 %v3294_v11 }
 0x9b5   :  { %2477 = vmatmul.mubr.msk.f32.vlgmr.msra.gmra.mrb[6].mxu0 %vm100_vm0, %v1003_v17  ;;  %2718 = vmatprep.subr.bf16.mxu1 %v3297_v12 }
 0x9b6   :  { %2672 = vmatpush1.bf16.msra.mxu0 %v3300_v19  ;;  %1256 = vmatprep.mubr.f32.mxu0 %v3118_v1 }
 0x9b7   :  { %2674 = vmatprep.subr.bf16.mxu0 %v3303_v20 }
 0x9ba   :  { %2676 = vmatpush1.bf16.msra.mxu0 %v3307_v28 }
 0x9bb   :  { %2678 = vmatprep.subr.bf16.mxu0 %v3311_v29 }
 0x9be   :  { %2680 = vmatpush1.bf16.msra.mxu0 %v3314_v35 }
 0x9bf   :  { %2682 = vmatprep.subr.bf16.mxu0 %v3317_v36 }
 0x9c2   :  { %2684 = vmatpush1.bf16.msra.mxu0 %v3320_v39 }
 0x9c3   :  { %2734 = vmatprep.subr.bf16.mxu0 %v3231_v5 }
 0x9c5   :  { %2478 = vmatmul.mubr.msk.f32.vlgmr.msra.gmra.mrb[6].mxu0 %vm100_vm0, %v1114_v7 }
 0x9c6   :  { %2736 = vmatpush1.bf16.msra.mxu0 %v3233_v9  ;;  %1644 = vmatprep.mubr.f32.mxu0 %v3118_v1 }
 0x9c7   :  { %2738 = vmatprep.subr.bf16.mxu0 %v3235_v10 }
 0x9ca   :  { %2740 = vmatpush1.bf16.msra.mxu0 %v3240_v15 }
 0x9cb   :  { %2742 = vmatprep.subr.bf16.mxu0 %v3244_v16 }
 0x9ce   :  { %2744 = vmatpush1.bf16.msra.mxu0 %v3248_v21 }
 0x9cf   :  { %2746 = vmatprep.subr.bf16.mxu0 %v3252_v22 }
 0x9d2   :  { %2748 = vmatpush1.bf16.msra.mxu0 %v3256_v25 }
 0x9d3   :  { %2750 = vmatprep.subr.bf16.mxu0 %v3273_v49 }
 0xa7a   :  { %v1359_v18 = vpop.f32.mrb[8].mxu1 }
 0xa7b   :  { %v1361_v23 = vpop.f32.mrb[9].mxu1 }
 0xa7c   :  { %v1366_v24 = vcombine.low %v1359_v18, %v1361_v23 }
 0xa7e   :  { %v1373_v27 = vrot.slane %v1366_v24, %v3265_v32 }
 0xa80   :  { %v1375_v30 = vadd.f32 %v1373_v27, %v1292_v26 }
 0xa82   :  { %1381 = vrot.lane.b32.xlu0 %v1375_v30, %s3114_s1  ;;  %v1376_v40 = vmul.f32 0.5, %v1375_v30 }
 0xa98   :  { %v1258_v31 = vpop.f32.mrb[6].mxu0 }
 0xa99   :  { %v1260_v33 = vpop.f32.mrb[7].mxu0  ;;  %v1263_v51 = vadd.f32 %v3354_v43, %v1258_v31 }
 0xa9a   :  { %v1264_v34 = vadd.f32 %v1260_v33, %v3358_v48 }
 0xa9b   :  { %v1265_v58 = vmul.f32 0.5, %v1263_v51 }
 0xa9c   :  { %2951 = vtanh.f32 %v1264_v34  ;;  %v1266_v23 = vmul.f32 0.5, %v1264_v34 }
 0xa9d   :  { %2953 = vtanh.f32 %v1376_v40 }
 0xaa6   :  { %v2952_v38 = vpop.eup %2951 }
 0xaa7   :  { %1276 = vrot.lane.b32.xlu1 %v2952_v38, %s3114_s1  ;;  %v2954_v46 = vpop.eup %2953  ;;  %v1579_v38 = vld [vmem:[#allocation3 + $0x14] sm:$0xf] }
 0xaa8   :  { %v1378_v47 = vmul.f32 0.5, %v2954_v46 }
 0xaaa   :  { %v1379_v52 = vadd.f32 0.5, %v1378_v47 }
 0xaac   :  { %v1386_v4 = vmul.f32 %v1379_v52, %v3461_v56  ;;  %v1395_v17 = vrot.slane %v1379_v52, 2 }
 0xaf4   :  { %v1382_v44 = vpop.permute.xlu0 %1381 }
 0xaf5   :  { %v1383_v45 = vrot.slane %v1382_v44, 2 }
 0xaf7   :  { %2955 = vtanh.f32 %v1383_v45 }
 0xaf8   :  { %2957 = vtanh.f32 %v1265_v58 }
 0xb01   :  { %v2956_v42 = vpop.eup %2955 }
 0xb02   :  { %v1387_v57 = vmul.f32 %v2956_v42, %v1379_v52  ;;  %v2958_v41 = vpop.eup %2957 }
 0xb03   :  { %v1269_v61 = vmul.f32 0.5, %v2958_v41 }
 0xb04   :  { %1389 = vrot.lane.b32.xlu0 %v1387_v57, %s3114_s1 }
 0xb05   :  { %v1271_v62 = vadd.f32 0.5, %v1269_v61 }
 0xb07   :  { %v1274_v55 = vmul.f32 %v1271_v62, %v3466_v37 }
 0xb19   :  { %v1277_v63 = vpop.permute.xlu1 %1276 }
 0xb1a   :  { %v1279_v0 = vmul.f32 %v1277_v63, %v1271_v62 }
 0xb1c   :  { %1281 = vrot.lane.b32.xlu1 %v1279_v0, %s3114_s1 }
 0xb76   :  { %v1390_v50 = vpop.permute.xlu0 %1389 }
 0xb77   :  { %v3508_v6 = vadd.f32 %v1390_v50, %v1386_v4 }
 0xb79   :  { %2959 = vtanh.f32 %v3508_v6 }
 0xb83   :  { %v2960_v7 = vpop.eup %2959 }
 0xb84   :  { %1398 = vrot.lane.b32.xlu0 %v2960_v7, %s3114_s1 }
 0xb8e   :  { %v1282_v8 = vpop.permute.xlu1 %1281 }
 0xb8f   :  { %v3513_v13 = vadd.f32 %v1282_v8, %v1274_v55 }
 0xb91   :  { %2961 = vtanh.f32 %v3513_v13 }
 0xb92   :  { %2963 = vtanh.f32 %v1266_v23 }
 0xb9b   :  { %v2962_v14 = vpop.eup %2961 }
 0xb9c   :  { %1287 = vrot.lane.b32.xlu1 %v2962_v14, %s3114_s1  ;;  %v2964_v37 = vpop.eup %2963 }
 0xb9d   :  { %v1270_v24 = vmul.f32 0.5, %v2964_v37 }
 0xb9f   :  { %v1272_v26 = vadd.f32 0.5, %v1270_v24 }
 0xbf6   :  { %v1399_v56 = vpop.permute.xlu0 %1398 }
 0xbf7   :  { %v1401_v18 = vmul.f32 %v1399_v56, %v1395_v17 }
 0xbf9   :  { %2482 = vmatmul.mubr.msk.f32.vlgmr.msra.gmra.mrb[8].mxu0 %vm100_vm0, %v1401_v18 }
 0xbfa   :  { %2752 = vmatpush1.bf16.msra.mxu0 %v3275_v53  ;;  %1756 = vmatprep.mubr.f32.mxu0 %v3118_v1 }
 0xbfb   :  { %2754 = vmatprep.subr.bf16.mxu0 %v3277_v54 }
 0xbfe   :  { %2756 = vmatpush1.bf16.msra.mxu0 %v3282_v59 }
 0xbff   :  { %2758 = vmatprep.subr.bf16.mxu0 %v3285_v60 }
 0xc02   :  { %2760 = vmatpush1.bf16.msra.mxu0 %v3288_v2 }
 0xc03   :  { %2762 = vmatprep.subr.bf16.mxu0 %v3291_v3 }
 0xc06   :  { %2764 = vmatpush1.bf16.msra.mxu0 %v3294_v11 }
 0xc07   :  { %2766 = vmatprep.subr.bf16.mxu0 %v3297_v12 }
 0xc0e   :  { %v1288_v27 = vpop.permute.xlu1 %1287 }
 0xc0f   :  { %v1290_v30 = vmul.f32 %v1288_v27, %v1272_v26 }
 0xc11   :  { %2480 = vmatmul.mubr.msk.f32.vlgmr.msra.gmra.mrb[10].mxu1 %vm100_vm0, %v1290_v30 }
 0xc12   :  { %2720 = vmatpush1.bf16.msra.mxu1 %v3300_v19  ;;  %1543 = vmatprep.mubr.f32.mxu1 %v3118_v1 }
 0xc13   :  { %2722 = vmatprep.subr.bf16.mxu1 %v3303_v20 }
 0xc16   :  { %2724 = vmatpush1.bf16.msra.mxu1 %v3307_v28 }
 0xc17   :  { %2726 = vmatprep.subr.bf16.mxu1 %v3311_v29 }
 0xc1a   :  { %2728 = vmatpush1.bf16.msra.mxu1 %v3314_v35 }
 0xc1b   :  { %2730 = vmatprep.subr.bf16.mxu1 %v3317_v36 }
 0xc1e   :  { %2732 = vmatpush1.bf16.msra.mxu1 %v3320_v39 }
 0xc1f   :  { %2782 = vmatprep.subr.bf16.mxu1 %v3231_v5 }
 0xc21   :  { %2481 = vmatmul.mubr.msk.f32.vlgmr.msra.gmra.mrb[10].mxu1 %vm100_vm0, %v1401_v18 }
 0xc22   :  { %2784 = vmatpush1.bf16.msra.mxu1 %v3233_v9  ;;  %1931 = vmatprep.mubr.f32.mxu1 %v3118_v1 }
 0xc23   :  { %2786 = vmatprep.subr.bf16.mxu1 %v3235_v10 }
 0xc26   :  { %2788 = vmatpush1.bf16.msra.mxu1 %v3240_v15 }
 0xc27   :  { %2790 = vmatprep.subr.bf16.mxu1 %v3244_v16 }
 0xc2a   :  { %2792 = vmatpush1.bf16.msra.mxu1 %v3248_v21 }
 0xc2b   :  { %2794 = vmatprep.subr.bf16.mxu1 %v3252_v22 }
 0xc2e   :  { %2796 = vmatpush1.bf16.msra.mxu1 %v3256_v25 }
 0xc2f   :  { %2798 = vmatprep.subr.bf16.mxu1 %v3273_v49 }
 0xccc   :  { %v1646_v31 = vpop.f32.mrb[8].mxu0 }
 0xccd   :  { %v1648_v33 = vpop.f32.mrb[9].mxu0 }
 0xcce   :  { %v1653_v34 = vcombine.low %v1646_v31, %v1648_v33 }
 0xcd0   :  { %v1660_v40 = vrot.slane %v1653_v34, %v3265_v32 }
 0xcd2   :  { %v1662_v44 = vadd.f32 %v1660_v40, %v1579_v38 }
 0xcd4   :  { %1668 = vrot.lane.b32.xlu0 %v1662_v44, %s3114_s1  ;;  %v1663_v52 = vmul.f32 0.5, %v1662_v44 }
 0xcf4   :  { %v1545_v45 = vpop.f32.mrb[10].mxu1 }
 0xcf5   :  { %v1547_v46 = vpop.f32.mrb[11].mxu1  ;;  %v1550_v0 = vadd.f32 %v3354_v43, %v1545_v45 }
 0xcf6   :  { %v1551_v47 = vadd.f32 %v1547_v46, %v3358_v48 }
 0xcf7   :  { %v1552_v4 = vmul.f32 0.5, %v1550_v0 }
 0xcf8   :  { %2965 = vtanh.f32 %v1551_v47 }
 0xcf9   :  { %2967 = vtanh.f32 %v1663_v52 }
 0xd02   :  { %v2966_v51 = vpop.eup %2965 }
 0xd03   :  { %1563 = vrot.lane.b32.xlu1 %v2966_v51, %s3114_s1  ;;  %v2968_v58 = vpop.eup %2967 }
 0xd04   :  { %v1665_v41 = vmul.f32 0.5, %v2968_v58 }
 0xd06   :  { %v1666_v61 = vadd.f32 0.5, %v1665_v41 }
 0xd08   :  { %v1673_v17 = vmul.f32 %v1666_v61, %v3508_v6  ;;  %v1682_v30 = vrot.slane %v1666_v61, 2 }
 0xd46   :  { %v1669_v42 = vpop.permute.xlu0 %1668 }
 0xd47   :  { %v1670_v57 = vrot.slane %v1669_v42, 2 }
 0xd49   :  { %2969 = vtanh.f32 %v1670_v57 }
 0xd4a   :  { %2971 = vtanh.f32 %v1552_v4 }
 0xd53   :  { %v2970_v62 = vpop.eup %2969 }
 0xd54   :  { %v1674_v63 = vmul.f32 %v2970_v62, %v1666_v61  ;;  %v2972_v50 = vpop.eup %2971 }
 0xd55   :  { %v1556_v7 = vmul.f32 0.5, %v2972_v50 }
 0xd56   :  { %1676 = vrot.lane.b32.xlu0 %v1674_v63, %s3114_s1 }
 0xd57   :  { %v1558_v55 = vadd.f32 0.5, %v1556_v7 }
 0xd59   :  { %v1561_v37 = vmul.f32 %v1558_v55, %v3513_v13  ;;  %v1553_v13 = vmul.f32 0.5, %v1551_v47 }
 0xd75   :  { %v1564_v8 = vpop.permute.xlu1 %1563 }
 0xd76   :  { %v1566_v14 = vmul.f32 %v1564_v8, %v1558_v55 }
 0xd78   :  { %1568 = vrot.lane.b32.xlu1 %v1566_v14, %s3114_s1 }
 0xdc8   :  { %v1677_v56 = vpop.permute.xlu0 %1676 }
 0xdc9   :  { %v3555_v18 = vadd.f32 %v1677_v56, %v1673_v17 }
 0xdcb   :  { %2973 = vtanh.f32 %v3555_v18 }
 0xdd5   :  { %v2974_v23 = vpop.eup %2973 }
 0xdd6   :  { %1685 = vrot.lane.b32.xlu0 %v2974_v23, %s3114_s1 }
 0xdea   :  { %v1569_v24 = vpop.permute.xlu1 %1568 }
 0xdeb   :  { %v3560_v26 = vadd.f32 %v1569_v24, %v1561_v37 }
 0xded   :  { %2975 = vtanh.f32 %v3560_v26 }
 0xdee   :  { %2977 = vtanh.f32 %v1553_v13 }
 0xdf7   :  { %v2976_v27 = vpop.eup %2975 }
 0xdf8   :  { %1574 = vrot.lane.b32.xlu1 %v2976_v27, %s3114_s1  ;;  %v2978_v33 = vpop.eup %2977 }
 0xdf9   :  { %v1557_v34 = vmul.f32 0.5, %v2978_v33 }
 0xdfb   :  { %v1559_v38 = vadd.f32 0.5, %v1557_v34 }
 0xe48   :  { %v1686_v6 = vpop.permute.xlu0 %1685 }
 0xe49   :  { %v1688_v31 = vmul.f32 %v1686_v6, %v1682_v30 }
 0xe4b   :  { %2485 = vmatmul.mubr.msk.f32.vlgmr.msra.gmra.mrb[12].mxu1 %vm100_vm0, %v1688_v31 }
 0xe4c   :  { %2800 = vmatpush1.bf16.msra.mxu1 %v3275_v53  ;;  %2043 = vmatprep.mubr.f32.mxu1 %v3118_v1 }
 0xe4d   :  { %2802 = vmatprep.subr.bf16.mxu1 %v3277_v54 }
 0xe50   :  { %2804 = vmatpush1.bf16.msra.mxu1 %v3282_v59 }
 0xe51   :  { %2806 = vmatprep.subr.bf16.mxu1 %v3285_v60 }
 0xe54   :  { %2808 = vmatpush1.bf16.msra.mxu1 %v3288_v2 }
 0xe55   :  { %2810 = vmatprep.subr.bf16.mxu1 %v3291_v3 }
 0xe58   :  { %2812 = vmatpush1.bf16.msra.mxu1 %v3294_v11 }
 0xe59   :  { %2814 = vmatprep.subr.bf16.mxu1 %v3297_v12 }
 0xe6a   :  { %v1575_v40 = vpop.permute.xlu1 %1574 }
 0xe6b   :  { %v1577_v44 = vmul.f32 %v1575_v40, %v1559_v38 }
 0xe6d   :  { %2483 = vmatmul.mubr.msk.f32.vlgmr.msra.gmra.mrb[10].mxu0 %vm100_vm0, %v1577_v44 }
 0xe6e   :  { %2768 = vmatpush1.bf16.msra.mxu0 %v3300_v19  ;;  %1830 = vmatprep.mubr.f32.mxu0 %v3118_v1 }
 0xe6f   :  { %2770 = vmatprep.subr.bf16.mxu0 %v3303_v20 }
 0xe72   :  { %2772 = vmatpush1.bf16.msra.mxu0 %v3307_v28 }
 0xe73   :  { %2774 = vmatprep.subr.bf16.mxu0 %v3311_v29 }
 0xe76   :  { %2776 = vmatpush1.bf16.msra.mxu0 %v3314_v35 }
 0xe77   :  { %2778 = vmatprep.subr.bf16.mxu0 %v3317_v36 }
 0xe7a   :  { %2780 = vmatpush1.bf16.msra.mxu0 %v3320_v39 }
 0xe7b   :  { %2830 = vmatprep.subr.bf16.mxu0 %v3231_v5 }
 0xe7d   :  { %2484 = vmatmul.mubr.msk.f32.vlgmr.msra.gmra.mrb[10].mxu0 %vm100_vm0, %v1688_v31 }
 0xe7e   :  { %2832 = vmatpush1.bf16.msra.mxu0 %v3233_v9  ;;  %2218 = vmatprep.mubr.f32.mxu0 %v3118_v1  ;;  %v1866_v9 = vld [vmem:[#allocation3 + $0x18] sm:$0xf] }
 0xe7f   :  { %2834 = vmatprep.subr.bf16.mxu0 %v3235_v10 }
 0xe82   :  { %2836 = vmatpush1.bf16.msra.mxu0 %v3240_v15 }
 0xe83   :  { %2838 = vmatprep.subr.bf16.mxu0 %v3244_v16 }
 0xe86   :  { %2840 = vmatpush1.bf16.msra.mxu0 %v3248_v21 }
 0xe87   :  { %2842 = vmatprep.subr.bf16.mxu0 %v3252_v22 }
 0xe8a   :  { %2844 = vmatpush1.bf16.msra.mxu0 %v3256_v25 }
 0xe8b   :  { %2846 = vmatprep.subr.bf16.mxu0 %v3273_v49 }
 0xf1e   :  { %v1933_v5 = vpop.f32.mrb[12].mxu1 }
 0xf1f   :  { %v1935_v45 = vpop.f32.mrb[13].mxu1 }
 0xf20   :  { %v1940_v46 = vcombine.low %v1933_v5, %v1935_v45 }
 0xf22   :  { %v1947_v47 = vrot.slane %v1940_v46, %v3265_v32 }
 0xf24   :  { %v1949_v51 = vadd.f32 %v1947_v47, %v1866_v9 }
 0xf26   :  { %1955 = vrot.lane.b32.xlu0 %v1949_v51, %s3114_s1  ;;  %v1950_v22 = vmul.f32 0.5, %v1949_v51  ;;  %v3015_v51 = vld.sshfl [vmem:[%s3668_s4] sm:$0x33 pattern:$0x76325410] }
 0xf50   :  { %v1832_v10 = vpop.f32.mrb[10].mxu0 }
 0xf51   :  { %v1834_v15 = vpop.f32.mrb[11].mxu0  ;;  %v1837_v61 = vadd.f32 %v3354_v43, %v1832_v10 }
 0xf52   :  { %v1838_v16 = vadd.f32 %v1834_v15, %v3358_v48 }
 0xf53   :  { %v1839_v62 = vmul.f32 0.5, %v1837_v61 }
 0xf54   :  { %2979 = vtanh.f32 %v1838_v16 }
 0xf55   :  { %2981 = vtanh.f32 %v1950_v22 }
 0xf5e   :  { %v2980_v21 = vpop.eup %2979 }
 0xf5f   :  { %1850 = vrot.lane.b32.xlu1 %v2980_v21, %s3114_s1  ;;  %v2982_v52 = vpop.eup %2981 }
 0xf60   :  { %v1952_v42 = vmul.f32 0.5, %v2982_v52 }
 0xf62   :  { %v1953_v57 = vadd.f32 0.5, %v1952_v42 }
 0xf64   :  { %v1960_v55 = vmul.f32 %v1953_v57, %v3555_v18  ;;  %v1969_v24 = vrot.slane %v1953_v57, 2 }
 0xf98   :  { %v1956_v25 = vpop.permute.xlu0 %1955 }
 0xf99   :  { %v1957_v49 = vrot.slane %v1956_v25, 2 }
 0xf9b   :  { %2983 = vtanh.f32 %v1957_v49 }
 0xf9c   :  { %2985 = vtanh.f32 %v1839_v62 }
 0xfa5   :  { %v2984_v58 = vpop.eup %2983 }
 0xfa6   :  { %v1961_v41 = vmul.f32 %v2984_v58, %v1953_v57  ;;  %v2986_v63 = vpop.eup %2985 }
 0xfa7   :  { %v1843_v0 = vmul.f32 0.5, %v2986_v63 }
 0xfa8   :  { %1963 = vrot.lane.b32.xlu0 %v1961_v41, %s3114_s1 }
 0xfa9   :  { %v1845_v4 = vadd.f32 0.5, %v1843_v0 }
 0xfab   :  { %v1848_v43 = vmul.f32 %v1845_v4, %v3560_v26  ;;  %v1840_v26 = vmul.f32 0.5, %v1838_v16 }
 0xfd1   :  { %v1851_v50 = vpop.permute.xlu1 %1850 }
 0xfd2   :  { %v1853_v7 = vmul.f32 %v1851_v50, %v1845_v4 }
 0xfd4   :  { %1855 = vrot.lane.b32.xlu1 %v1853_v7, %s3114_s1 }
0x101a   :  { %v1964_v8 = vpop.permute.xlu0 %1963 }
0x101b   :  { %v3602_v14 = vadd.f32 %v1964_v8, %v1960_v55 }
0x101d   :  { %2987 = vtanh.f32 %v3602_v14 }
0x1027   :  { %v2988_v17 = vpop.eup %2987 }
0x1028   :  { %1972 = vrot.lane.b32.xlu0 %v2988_v17, %s3114_s1 }
0x1046   :  { %v1856_v56 = vpop.permute.xlu1 %1855 }
0x1047   :  { %v3607_v23 = vadd.f32 %v1856_v56, %v1848_v43 }
0x1049   :  { %2989 = vtanh.f32 %v3607_v23 }
0x104a   :  { %2991 = vtanh.f32 %v1840_v26 }
0x1053   :  { %v2990_v37 = vpop.eup %2989 }
0x1054   :  { %1861 = vrot.lane.b32.xlu1 %v2990_v37, %s3114_s1  ;;  %v2992_v30 = vpop.eup %2991 }
0x109a   :  { %v1973_v18 = vpop.permute.xlu0 %1972 }
0x109b   :  { %v1975_v27 = vmul.f32 %v1973_v18, %v1969_v24 }
0x109d   :  { %2488 = vmatmul.mubr.msk.f32.vlgmr.msra.gmra.mrb[12].mxu0 %vm100_vm0, %v1975_v27 }
0x109e   :  { %2848 = vmatpush1.bf16.msra.mxu0 %v3275_v53  ;;  %2330 = vmatprep.mubr.f32.mxu0 %v3118_v1  ;;  %v1844_v53 = vmul.f32 0.5, %v2992_v30 }
0x109f   :  { %2850 = vmatprep.subr.bf16.mxu0 %v3277_v54 }
0x10a0   :  { %v1846_v6 = vadd.f32 0.5, %v1844_v53 }
0x10a2   :  { %2852 = vmatpush1.bf16.msra.mxu0 %v3282_v59 }
0x10a3   :  { %2854 = vmatprep.subr.bf16.mxu0 %v3285_v60 }
0x10a6   :  { %2856 = vmatpush1.bf16.msra.mxu0 %v3288_v2  ;;  %v2153_v2 = vld [vmem:[#allocation3 + $0x1c] sm:$0xf] }
0x10a7   :  { %2858 = vmatprep.subr.bf16.mxu0 %v3291_v3 }
0x10aa   :  { %2860 = vmatpush1.bf16.msra.mxu0 %v3294_v11 }
0x10ab   :  { %2862 = vmatprep.subr.bf16.mxu0 %v3297_v12 }
0x10c6   :  { %v1862_v31 = vpop.permute.xlu1 %1861 }
0x10c7   :  { %v1864_v13 = vmul.f32 %v1862_v31, %v1846_v6 }
0x10c9   :  { %2486 = vmatmul.mubr.msk.f32.vlgmr.msra.gmra.mrb[14].mxu1 %vm100_vm0, %v1864_v13  ;;  %v2491_v13 = vld [vmem:[%s3669_s5] ss:$0 sm:$0xff] }
0x10ca   :  { %2816 = vmatpush1.bf16.msra.mxu1 %v3300_v19  ;;  %2117 = vmatprep.mubr.f32.mxu1 %v3118_v1 }
0x10cb   :  { %2818 = vmatprep.subr.bf16.mxu1 %v3303_v20 }
0x10ce   :  { %2820 = vmatpush1.bf16.msra.mxu1 %v3307_v28 }
0x10cf   :  { %2822 = vmatprep.subr.bf16.mxu1 %v3311_v29 }
0x10d2   :  { %2824 = vmatpush1.bf16.msra.mxu1 %v3314_v35 }
0x10d3   :  { %2826 = vmatprep.subr.bf16.mxu1 %v3317_v36 }
0x10d6   :  { %2828 = vmatpush1.bf16.msra.mxu1 %v3320_v39 }
0x10d9   :  { %2487 = vmatmul.mubr.msk.f32.vlgmr.msra.gmra.mrb[14].mxu1 %vm100_vm0, %v1975_v27 }
0x1170   :  { %v2220_v54 = vpop.f32.mrb[12].mxu0 }
0x1171   :  { %v2222_v59 = vpop.f32.mrb[13].mxu0 }
0x1172   :  { %v2227_v60 = vcombine.low %v2220_v54, %v2222_v59 }
0x1174   :  { %v2234_v3 = vrot.slane %v2227_v60, %v3265_v32 }
0x1176   :  { %v2236_v11 = vadd.f32 %v2234_v3, %v2153_v2  ;;  %v2492_v2 = vld [vmem:[#allocation2] ss:$0 sm:$0xff] }
0x1178   :  { %2242 = vrot.lane.b32.xlu0 %v2236_v11, %s3114_s1  ;;  %v2237_v40 = vmul.f32 0.5, %v2236_v11 }
0x11ac   :  { %v2119_v12 = vpop.f32.mrb[14].mxu1 }
0x11ad   :  { %v2121_v33 = vpop.f32.mrb[15].mxu1  ;;  %v2124_v10 = vadd.f32 %v3015_v51, %v2119_v12 }
0x11ae   :  { %v2125_v34 = vadd.f32 %v2121_v33, %v3358_v48 }
0x11af   :  { %v2126_v15 = vmul.f32 0.5, %v2124_v10 }
0x11b0   :  { %2993 = vtanh.f32 %v2125_v34  ;;  %v2127_v0 = vmul.f32 0.5, %v2125_v34 }
0x11b1   :  { %2995 = vtanh.f32 %v2237_v40 }
0x11ba   :  { %v2994_v38 = vpop.eup %2993 }
0x11bb   :  { %2137 = vrot.lane.b32.xlu1 %v2994_v38, %s3114_s1  ;;  %v2996_v45 = vpop.eup %2995 }
0x11bc   :  { %v2239_v46 = vmul.f32 0.5, %v2996_v45 }
0x11be   :  { %v2240_v9 = vadd.f32 0.5, %v2239_v46 }
0x11c0   :  { %v2247_v52 = vmul.f32 %v2240_v9, %v3602_v14  ;;  %v2256_v17 = vrot.slane %v2240_v9, 2 }
0x11ea   :  { %v2243_v44 = vpop.permute.xlu0 %2242 }
0x11eb   :  { %v2244_v5 = vrot.slane %v2243_v44, 2 }
0x11ed   :  { %2997 = vtanh.f32 %v2244_v5 }
0x11ee   :  { %2999 = vtanh.f32 %v2126_v15 }
0x11f7   :  { %v2998_v32 = vpop.eup %2997 }
0x11f8   :  { %v2248_v47 = vmul.f32 %v2998_v32, %v2240_v9  ;;  %v3000_v16 = vpop.eup %2999 }
0x11f9   :  { %v2130_v21 = vmul.f32 0.5, %v3000_v16 }
0x11fa   :  { %2250 = vrot.lane.b32.xlu0 %v2248_v47, %s3114_s1 }
0x11fb   :  { %v2132_v22 = vadd.f32 0.5, %v2130_v21 }
0x11fd   :  { %v2135_v41 = vmul.f32 %v2132_v22, %v3607_v23 }
0x122d   :  { %v2138_v25 = vpop.permute.xlu1 %2137 }
0x122e   :  { %v2140_v49 = vmul.f32 %v2138_v25, %v2132_v22 }
0x1230   :  { %2142 = vrot.lane.b32.xlu1 %v2140_v49, %s3114_s1 }
0x126c   :  { %v2251_v42 = vpop.permute.xlu0 %2250 }
0x126d   :  { %v2253_v57 = vadd.f32 %v2251_v42, %v2247_v52 }
0x126f   :  { %3001 = vtanh.f32 %v2253_v57 }
0x1279   :  { %v3002_v58 = vpop.eup %3001 }
0x127a   :  { %2259 = vrot.lane.b32.xlu0 %v3002_v58, %s3114_s1 }
0x12a2   :  { %v2143_v61 = vpop.permute.xlu1 %2142 }
0x12a3   :  { %v2145_v62 = vadd.f32 %v2143_v61, %v2135_v41 }
0x12a5   :  { %3003 = vtanh.f32 %v2145_v62 }
0x12a6   :  { %3005 = vtanh.f32 %v2127_v0 }
0x12af   :  { %v3004_v63 = vpop.eup %3003 }
0x12b0   :  { %2148 = vrot.lane.b32.xlu1 %v3004_v63, %s3114_s1  ;;  %v3006_v4 = vpop.eup %3005 }
0x12b1   :  { %v2131_v50 = vmul.f32 0.5, %v3006_v4 }
0x12b3   :  { %v2133_v7 = vadd.f32 0.5, %v2131_v50 }
0x12ec   :  { %v2260_v14 = vpop.permute.xlu0 %2259 }
0x12ed   :  { %v2262_v43 = vmul.f32 %v2260_v14, %v2256_v17 }
0x1322   :  { %v2149_v55 = vpop.permute.xlu1 %2148 }
0x1323   :  { %v2151_v8 = vmul.f32 %v2149_v55, %v2133_v7 }
0x1325   :  { %2489 = vmatmul.mubr.msk.f32.vlgmr.msra.gmra.mrb[14].mxu0 %vm100_vm0, %v2151_v8 }
0x1326   :  { %2864 = vmatpush1.bf16.msra.mxu0 %v3300_v19  ;;  %2404 = vmatprep.mubr.f32.mxu0 %v3118_v1 }
0x1327   :  { %2866 = vmatprep.subr.bf16.mxu0 %v3303_v20 }
0x132a   :  { %2868 = vmatpush1.bf16.msra.mxu0 %v3307_v28 }
0x132b   :  { %2870 = vmatprep.subr.bf16.mxu0 %v3311_v29 }
0x132e   :  { %2872 = vmatpush1.bf16.msra.mxu0 %v3314_v35 }
0x132f   :  { %2874 = vmatprep.subr.bf16.mxu0 %v3317_v36 }
0x1332   :  { %2876 = vmatpush1.bf16.msra.mxu0 %v3320_v39 }
0x1335   :  { %2490 = vmatmul.mubr.msk.f32.vlgmr.msra.gmra.mrb[14].mxu0 %vm100_vm0, %v2262_v43 }
0x1408   :  { %v2406_v19 = vpop.f32.mrb[14].mxu0 }
0x1409   :  { %v2408_v56 = vpop.f32.mrb[15].mxu0  ;;  %v2411_v28 = vadd.f32 %v3015_v51, %v2406_v19 }
0x140a   :  { %v2412_v1 = vadd.f32 %v2408_v56, %v3358_v48 }
0x140b   :  { %v2413_v29 = vmul.f32 0.5, %v2411_v28 }
0x140c   :  { %3007 = vtanh.f32 %v2412_v1  ;;  %v2414_v48 = vmul.f32 0.5, %v2412_v1 }
0x140d   :  { %3009 = vtanh.f32 %v2413_v29 }
0x1416   :  { %v3008_v20 = vpop.eup %3007 }
0x1417   :  { %2424 = vrot.lane.b32.xlu1 %v3008_v20, %s3114_s1  ;;  %v3010_v35 = vpop.eup %3009 }
0x1418   :  { %v2417_v36 = vmul.f32 0.5, %v3010_v35 }
0x141a   :  { %v2419_v23 = vadd.f32 0.5, %v2417_v36 }
0x141c   :  { %v2422_v39 = vmul.f32 %v2419_v23, %v2145_v62 }
0x1489   :  { %v2425_v37 = vpop.permute.xlu1 %2424 }
0x148a   :  { %v2427_v24 = vmul.f32 %v2425_v37, %v2419_v23 }
0x148c   :  { %2429 = vrot.lane.b32.xlu0 %v2427_v24, %s3114_s1 }
0x14fe   :  { %v2430_v18 = vpop.permute.xlu0 %2429 }
0x14ff   :  { %v2432_v27 = vadd.f32 %v2430_v18, %v2422_v39 }
0x1501   :  { %3011 = vtanh.f32 %v2432_v27 }
0x1502   :  { %3013 = vtanh.f32 %v2414_v48 }
0x150b   :  { %v3012_v26 = vpop.eup %3011 }
0x150c   :  { %2435 = vrot.lane.b32.xlu1 %v3012_v26, %s3114_s1  ;;  %v3014_v30 = vpop.eup %3013 }
0x150d   :  { %v2418_v53 = vmul.f32 0.5, %v3014_v30 }
0x150f   :  { %v2420_v6 = vadd.f32 0.5, %v2418_v53 }
0x157e   :  { %v2436_v31 = vpop.permute.xlu1 %2435 }
0x157f   :  { %v2438_v54 = vmul.f32 %v2436_v31, %v2420_v6 }
0x1581   :  { %v2446_v59 = vmul.f32 %v2491_v13, %v2438_v54 }
0x1583   :  { %v2448_v60 = vsel %vm2447_vm1, %v2446_v59, 0.0 }
0x1584   :  { %2449 = vadd.xlane.f32.xlu0 %v2448_v60 }
0x1611   :  { %v2450_v3 = vpop.xlane.xlu0 %2449 }
0x1612   :  { %v2458_v11 = vadd.f32 %v2492_v2, %v2450_v3 }
0x1614   :  { %2460 = vst.msk [vmem:[%s3671_s7] sm:$0x3] %vm2459_vm2, %v2458_v11 }
0x1615   :  { %2465 = vsyncpa [#allocation4], 1 }
0x1616   :  { %2466 = vsyncpa [#allocation6], 1 }
0x1617   :  { %2467 = vsyncpa [#allocation9], 1 }

</bundles_post_ra>
